<compile_context>
chip_gen: v6e
topology: v6e:2x2x1
jax: 0.10.0
libtpu: 0.0.40
codegen_flags: <defaults>
</compile_context>

<pallas_src>
import math
from typing import Dict

import jax
import jax.numpy as jnp
from jax.experimental import pallas as pl
from jax.experimental.pallas import tpu as pltpu

MLP_HIDDEN = (256, 256, 256)   # BaseNet.mlp_config['hidden_channels']
LANE = 128


def _round_up(n: int, m: int) -> int:
    return ((n + m - 1) // m) * m


def _fusion_kernel(xm_ref, xn_ref,
                   w1_ref, b1_ref, w2_ref, b2_ref, w3_ref, b3_ref,
                   wi1a_ref, wi1b_ref, bi1_ref, wi2_ref, bi2_ref, wi3_ref, bi3_ref,
                   wh_ref, bh_ref, out_ref):
    cd = w1_ref.dtype          # matmul operand dtype (bf16 by default)
    f32 = jnp.float32

    # ---- extractor_mlp: Linear+ReLU, Linear+ReLU, Linear (no act on last layer)
    h = jnp.dot(xm_ref[...], w1_ref[...], preferred_element_type=f32)
    h = jnp.maximum(h + b1_ref[...], 0.0)
    h = jnp.dot(h.astype(cd), w2_ref[...], preferred_element_type=f32)
    h = jnp.maximum(h + b2_ref[...], 0.0)
    h = jnp.dot(h.astype(cd), w3_ref[...], preferred_element_type=f32) + b3_ref[...]

    # ---- inter_mlp layer 1 on cat([out_mlp, out_net], dim=1); concat folded into
    #      two dots: cat([m, n]) @ Wi1 == m @ Wi1[:256] + n @ Wi1[256:]
    g = (jnp.dot(h.astype(cd), wi1a_ref[...], preferred_element_type=f32)
         + jnp.dot(xn_ref[...], wi1b_ref[...], preferred_element_type=f32))
    g = jnp.maximum(g + bi1_ref[...], 0.0)
    g = jnp.dot(g.astype(cd), wi2_ref[...], preferred_element_type=f32)
    g = jnp.maximum(g + bi2_ref[...], 0.0)
    g = jnp.dot(g.astype(cd), wi3_ref[...], preferred_element_type=f32) + bi3_ref[...]

    # ---- all per-label classifier heads fused into one lane-dense (padded) Linear
    out_ref[...] = (jnp.dot(g.astype(cd), wh_ref[...], preferred_element_type=f32)
                    + bh_ref[...]).astype(out_ref.dtype)


def multinet_fusion_fused(x_mlp, x_net_feat, params, *, bm=128,
                          compute_dtype=jnp.bfloat16):
    """Fused forward. Returns (B, O_pad) float32 (padded head columns are zero)."""
    B, F = x_mlp.shape
    _, FN = x_net_feat.shape
    O_pad = params["head_w"].shape[1]

    # Batch tile: 128 (full MXU M) by default; for small B cap at ceil(B/2) rounded
    # up to a multiple of 8 so the grid still has >=2 steps (v7x megacore sharding).
    bm = min(bm, max(8, _round_up(-(-B // 2), 8)))
    grid = (pl.cdiv(B, bm),)

    cast = lambda a: a.astype(compute_dtype)
    full = lambda a: pl.BlockSpec(a.shape, lambda i: (0,) * a.ndim)

    w_names = ("w1", "w2", "w3", "wi1a", "wi1b", "wi2", "wi3", "head_w")
    b_names = ("b1", "b2", "b3", "bi1", "bi2", "bi3", "head_b")
    p = {k: cast(params[k]) for k in w_names}                     # bf16 matmul weights
    p.update({k: params[k].astype(jnp.float32) for k in b_names})  # f32 biases (epilogue)

    operands = (cast(x_mlp), cast(x_net_feat),
                p["w1"], p["b1"], p["w2"], p["b2"], p["w3"], p["b3"],
                p["wi1a"], p["wi1b"], p["bi1"], p["wi2"], p["bi2"],
                p["wi3"], p["bi3"], p["head_w"], p["head_b"])

    in_specs = [pl.BlockSpec((bm, F), lambda i: (i, 0)),
                pl.BlockSpec((bm, FN), lambda i: (i, 0))]
    in_specs += [full(op) for op in operands[2:]]

    return pl.pallas_call(
        _fusion_kernel,
        out_shape=jax.ShapeDtypeStruct((B, O_pad), jnp.float32),
        grid=grid,
        in_specs=in_specs,
        out_specs=pl.BlockSpec((bm, O_pad), lambda i: (i, 0)),
        compiler_params=pltpu.CompilerParams(
            dimension_semantics=("parallel",)),
    )(*operands)


def multinet_fusion_forward(x_mlp, x_net_feat, params, num_outputs_for_label,
                            *, bm=128, compute_dtype=jnp.bfloat16):
    """Full MultiNetFusion.forward: returns {label_name: (B, num_outputs)}."""
    fused = multinet_fusion_fused(x_mlp, x_net_feat, params, bm=bm,
                                  compute_dtype=compute_dtype)
    out, off = {}, 0
    for label, n_out in num_outputs_for_label.items():
        out[label] = fused[:, off:off + n_out]
        off += n_out
    return out


def init_params(key, mlp_num_inputs: int, net_features: int,
                num_outputs_for_label: Dict[str, int]):
    """Deterministic synthetic params; shapes match the torch module (stored (in, out))."""
    def linear(k, fan_in, fan_out):
        kw, kb = jax.random.split(k)
        bound = 1.0 / math.sqrt(fan_in)
        w = jax.random.uniform(kw, (fan_in, fan_out), jnp.float32, -bound, bound)
        b = jax.random.uniform(kb, (1, fan_out), jnp.float32, -bound, bound)
        return w, b

    keys = jax.random.split(key, 7)
    params = {}

    # extractor_mlp
    dims = (mlp_num_inputs,) + MLP_HIDDEN
    for li in range(3):
        w, b = linear(keys[li], dims[li], dims[li + 1])
        params[f"w{li + 1}"] = w
        params[f"b{li + 1}"] = b

    # inter_mlp: first layer acts on cat([mlp_feat(256), net_feat]); stored split
    inter_in = MLP_HIDDEN[-1] + net_features
    wi1, bi1 = linear(keys[3], inter_in, MLP_HIDDEN[0])
    params["wi1a"] = wi1[:MLP_HIDDEN[-1]]
    params["wi1b"] = wi1[MLP_HIDDEN[-1]:]
    params["bi1"] = bi1
    params["wi2"], params["bi2"] = linear(keys[4], MLP_HIDDEN[0], MLP_HIDDEN[1])
    params["wi3"], params["bi3"] = linear(keys[5], MLP_HIDDEN[1], MLP_HIDDEN[2])

    # per-label heads, fused and zero-padded to a lane-dense width (multiple of 128)
    in_features = MLP_HIDDEN[-1]
    hkeys = jax.random.split(keys[6], max(1, len(num_outputs_for_label)))
    head_ws, head_bs = [], []
    for hk, n_out in zip(hkeys, num_outputs_for_label.values()):
        w, b = linear(hk, in_features, n_out)
        head_ws.append(w)
        head_bs.append(b)
    total = sum(num_outputs_for_label.values())
    o_pad = _round_up(max(total, 1), LANE)
    head_w = jnp.concatenate(head_ws, axis=1)
    head_b = jnp.concatenate(head_bs, axis=1)
    params["head_w"] = jnp.pad(head_w, ((0, 0), (0, o_pad - total)))
    params["head_b"] = jnp.pad(head_b, ((0, 0), (0, o_pad - total)))
    return params


def _reference_forward(x_mlp, x_net_feat, params, num_outputs_for_label,
                       dot_dtype=jnp.float32):
    """Pure-JAX reference; dot_dtype controls matmul-operand precision."""
    def lin(x, w, b):
        return jnp.dot(x.astype(dot_dtype), w.astype(dot_dtype),
                       preferred_element_type=jnp.float32) + b

    p = params
    h = jnp.maximum(lin(x_mlp, p["w1"], p["b1"]), 0.0)
    h = jnp.maximum(lin(h, p["w2"], p["b2"]), 0.0)
    h = lin(h, p["w3"], p["b3"])
    feat = jnp.concatenate([h, x_net_feat.astype(jnp.float32)], axis=1)
    wi1 = jnp.concatenate([p["wi1a"], p["wi1b"]], axis=0)
    g = jnp.maximum(lin(feat, wi1, p["bi1"]), 0.0)
    g = jnp.maximum(lin(g, p["wi2"], p["bi2"]), 0.0)
    g = lin(g, p["wi3"], p["bi3"])
    fused = lin(g, p["head_w"], p["head_b"])
    out, off = {}, 0
    for label, n_out in num_outputs_for_label.items():
        out[label] = fused[:, off:off + n_out]
        off += n_out
    return out


if __name__ == "__main__":
    B = 16
    MLP_NUM_INPUTS = 32    # tabular feature dimension (x_mlp)
    NET_FEATURES = 512     # pooled feature width of extractor_net (e.g. ResNet18)
    num_outputs_for_label = {"label_A": 3, "label_B": 2}

    key = jax.random.PRNGKey(0)
    kx1, kx2, kp = jax.random.split(key, 3)
    x_mlp = jax.random.normal(kx1, (B, MLP_NUM_INPUTS), jnp.float32)
    x_net_feat = jax.random.normal(kx2, (B, NET_FEATURES), jnp.float32)
    params = init_params(kp, MLP_NUM_INPUTS, NET_FEATURES, num_outputs_for_label)

    out = multinet_fusion_forward(x_mlp, x_net_feat, params, num_outputs_for_label)
    jax.block_until_ready(out)

    # Matched-precision reference (bf16 matmul operands, f32 accumulation).
    ref_bf16 = _reference_forward(x_mlp, x_net_feat, params, num_outputs_for_label,
                                  dot_dtype=jnp.bfloat16)
    # Full-f32 reference as a loose sanity check on the bf16 matmul path.
    ref_f32 = _reference_forward(x_mlp, x_net_feat, params, num_outputs_for_label,
                                 dot_dtype=jnp.float32)

    for label, n_out in num_outputs_for_label.items():
        assert out[label].shape == (B, n_out)
        assert jnp.allclose(out[label], ref_bf16[label], atol=2e-3, rtol=2e-3), label
        assert jnp.allclose(out[label], ref_f32[label], atol=1e-1, rtol=1e-1), label

    print("KERNEL_OK")
</pallas_src>

<mosaic_0001>
module attributes {stable_mosaic.version = 11 : i64} {
  func.func @_fusion_kernel(%arg0: i32, %arg1: memref<8x32xbf16, #tpu.memory_space<vmem>>, %arg2: memref<8x512xbf16, #tpu.memory_space<vmem>>, %arg3: memref<32x256xbf16, #tpu.memory_space<vmem>>, %arg4: memref<1x256xf32, #tpu.memory_space<vmem>>, %arg5: memref<256x256xbf16, #tpu.memory_space<vmem>>, %arg6: memref<1x256xf32, #tpu.memory_space<vmem>>, %arg7: memref<256x256xbf16, #tpu.memory_space<vmem>>, %arg8: memref<1x256xf32, #tpu.memory_space<vmem>>, %arg9: memref<256x256xbf16, #tpu.memory_space<vmem>>, %arg10: memref<512x256xbf16, #tpu.memory_space<vmem>>, %arg11: memref<1x256xf32, #tpu.memory_space<vmem>>, %arg12: memref<256x256xbf16, #tpu.memory_space<vmem>>, %arg13: memref<1x256xf32, #tpu.memory_space<vmem>>, %arg14: memref<256x256xbf16, #tpu.memory_space<vmem>>, %arg15: memref<1x256xf32, #tpu.memory_space<vmem>>, %arg16: memref<256x128xbf16, #tpu.memory_space<vmem>>, %arg17: memref<1x128xf32, #tpu.memory_space<vmem>>, %arg18: memref<8x128xf32, #tpu.memory_space<vmem>>) attributes {dimension_semantics = [#tpu.dimension_semantics<parallel>], iteration_bounds = array<i64: 2>, scalar_prefetch = 0 : i64, scratch_operands = 0 : i64, tpu.core_type = #tpu.core_type<tc>, window_params = [{transform_indices = @transform_0, window_bounds = array<i64: 8, 32>}, {transform_indices = @transform_1, window_bounds = array<i64: 8, 512>}, {pipeline_mode = #tpu.pipeline_mode<synchronous>, transform_indices = @transform_2, window_bounds = array<i64: 32, 256>}, {pipeline_mode = #tpu.pipeline_mode<synchronous>, transform_indices = @transform_3, window_bounds = array<i64: 1, 256>}, {pipeline_mode = #tpu.pipeline_mode<synchronous>, transform_indices = @transform_4, window_bounds = array<i64: 256, 256>}, {pipeline_mode = #tpu.pipeline_mode<synchronous>, transform_indices = @transform_5, window_bounds = array<i64: 1, 256>}, {pipeline_mode = #tpu.pipeline_mode<synchronous>, transform_indices = @transform_6, window_bounds = array<i64: 256, 256>}, {pipeline_mode = #tpu.pipeline_mode<synchronous>, transform_indices = @transform_7, window_bounds = array<i64: 1, 256>}, {pipeline_mode = #tpu.pipeline_mode<synchronous>, transform_indices = @transform_8, window_bounds = array<i64: 256, 256>}, {pipeline_mode = #tpu.pipeline_mode<synchronous>, transform_indices = @transform_9, window_bounds = array<i64: 512, 256>}, {pipeline_mode = #tpu.pipeline_mode<synchronous>, transform_indices = @transform_10, window_bounds = array<i64: 1, 256>}, {pipeline_mode = #tpu.pipeline_mode<synchronous>, transform_indices = @transform_11, window_bounds = array<i64: 256, 256>}, {pipeline_mode = #tpu.pipeline_mode<synchronous>, transform_indices = @transform_12, window_bounds = array<i64: 1, 256>}, {pipeline_mode = #tpu.pipeline_mode<synchronous>, transform_indices = @transform_13, window_bounds = array<i64: 256, 256>}, {pipeline_mode = #tpu.pipeline_mode<synchronous>, transform_indices = @transform_14, window_bounds = array<i64: 1, 256>}, {pipeline_mode = #tpu.pipeline_mode<synchronous>, transform_indices = @transform_15, window_bounds = array<i64: 256, 128>}, {pipeline_mode = #tpu.pipeline_mode<synchronous>, transform_indices = @transform_16, window_bounds = array<i64: 1, 128>}, {transform_indices = @transform_17, window_bounds = array<i64: 8, 128>}]} {
    %c0 = arith.constant 0 : index
    %c0_0 = arith.constant 0 : index
    %0 = vector.load %arg1[%c0, %c0_0] : memref<8x32xbf16, #tpu.memory_space<vmem>>, vector<8x32xbf16>
    %c0_1 = arith.constant 0 : index
    %c0_2 = arith.constant 0 : index
    %1 = vector.load %arg3[%c0_1, %c0_2] : memref<32x256xbf16, #tpu.memory_space<vmem>>, vector<32x256xbf16>
    %cst = arith.constant dense<0.000000e+00> : vector<8x256xf32>
    %2 = tpu.matmul %0, %1, %cst {dimension_numbers = #tpu.dot_dimension_numbers<[1], [0], [0], [1], [0, 0, 1, 1], [], []>} : vector<8x32xbf16>, vector<32x256xbf16>, vector<8x256xf32> -> vector<8x256xf32>
    %c0_3 = arith.constant 0 : index
    %c0_4 = arith.constant 0 : index
    %3 = vector.load %arg4[%c0_3, %c0_4] : memref<1x256xf32, #tpu.memory_space<vmem>>, vector<1x256xf32>
    %4 = vector.broadcast %3 : vector<1x256xf32> to vector<8x256xf32>
    %5 = arith.addf %2, %4 : vector<8x256xf32>
    %cst_5 = arith.constant 0.000000e+00 : f32
    %6 = vector.broadcast %cst_5 : f32 to vector<8x256xf32>
    %7 = arith.maximumf %5, %6 : vector<8x256xf32>
    %8 = arith.truncf %7 : vector<8x256xf32> to vector<8x256xbf16>
    %c0_6 = arith.constant 0 : index
    %c0_7 = arith.constant 0 : index
    %9 = vector.load %arg5[%c0_6, %c0_7] : memref<256x256xbf16, #tpu.memory_space<vmem>>, vector<256x256xbf16>
    %cst_8 = arith.constant dense<0.000000e+00> : vector<8x256xf32>
    %10 = tpu.matmul %8, %9, %cst_8 {dimension_numbers = #tpu.dot_dimension_numbers<[1], [0], [0], [1], [0, 0, 1, 1], [], []>} : vector<8x256xbf16>, vector<256x256xbf16>, vector<8x256xf32> -> vector<8x256xf32>
    %c0_9 = arith.constant 0 : index
    %c0_10 = arith.constant 0 : index
    %11 = vector.load %arg6[%c0_9, %c0_10] : memref<1x256xf32, #tpu.memory_space<vmem>>, vector<1x256xf32>
    %12 = vector.broadcast %11 : vector<1x256xf32> to vector<8x256xf32>
    %13 = arith.addf %10, %12 : vector<8x256xf32>
    %cst_11 = arith.constant 0.000000e+00 : f32
    %14 = vector.broadcast %cst_11 : f32 to vector<8x256xf32>
    %15 = arith.maximumf %13, %14 : vector<8x256xf32>
    %16 = arith.truncf %15 : vector<8x256xf32> to vector<8x256xbf16>
    %c0_12 = arith.constant 0 : index
    %c0_13 = arith.constant 0 : index
    %17 = vector.load %arg7[%c0_12, %c0_13] : memref<256x256xbf16, #tpu.memory_space<vmem>>, vector<256x256xbf16>
    %cst_14 = arith.constant dense<0.000000e+00> : vector<8x256xf32>
    %18 = tpu.matmul %16, %17, %cst_14 {dimension_numbers = #tpu.dot_dimension_numbers<[1], [0], [0], [1], [0, 0, 1, 1], [], []>} : vector<8x256xbf16>, vector<256x256xbf16>, vector<8x256xf32> -> vector<8x256xf32>
    %c0_15 = arith.constant 0 : index
    %c0_16 = arith.constant 0 : index
    %19 = vector.load %arg8[%c0_15, %c0_16] : memref<1x256xf32, #tpu.memory_space<vmem>>, vector<1x256xf32>
    %20 = vector.broadcast %19 : vector<1x256xf32> to vector<8x256xf32>
    %21 = arith.addf %18, %20 : vector<8x256xf32>
    %22 = arith.truncf %21 : vector<8x256xf32> to vector<8x256xbf16>
    %c0_17 = arith.constant 0 : index
    %c0_18 = arith.constant 0 : index
    %23 = vector.load %arg9[%c0_17, %c0_18] : memref<256x256xbf16, #tpu.memory_space<vmem>>, vector<256x256xbf16>
    %cst_19 = arith.constant dense<0.000000e+00> : vector<8x256xf32>
    %24 = tpu.matmul %22, %23, %cst_19 {dimension_numbers = #tpu.dot_dimension_numbers<[1], [0], [0], [1], [0, 0, 1, 1], [], []>} : vector<8x256xbf16>, vector<256x256xbf16>, vector<8x256xf32> -> vector<8x256xf32>
    %c0_20 = arith.constant 0 : index
    %c0_21 = arith.constant 0 : index
    %25 = vector.load %arg2[%c0_20, %c0_21] : memref<8x512xbf16, #tpu.memory_space<vmem>>, vector<8x512xbf16>
    %c0_22 = arith.constant 0 : index
    %c0_23 = arith.constant 0 : index
    %26 = vector.load %arg10[%c0_22, %c0_23] : memref<512x256xbf16, #tpu.memory_space<vmem>>, vector<512x256xbf16>
    %cst_24 = arith.constant dense<0.000000e+00> : vector<8x256xf32>
    %27 = tpu.matmul %25, %26, %cst_24 {dimension_numbers = #tpu.dot_dimension_numbers<[1], [0], [0], [1], [0, 0, 1, 1], [], []>} : vector<8x512xbf16>, vector<512x256xbf16>, vector<8x256xf32> -> vector<8x256xf32>
    %28 = arith.addf %24, %27 : vector<8x256xf32>
    %c0_25 = arith.constant 0 : index
    %c0_26 = arith.constant 0 : index
    %29 = vector.load %arg11[%c0_25, %c0_26] : memref<1x256xf32, #tpu.memory_space<vmem>>, vector<1x256xf32>
    %30 = vector.broadcast %29 : vector<1x256xf32> to vector<8x256xf32>
    %31 = arith.addf %28, %30 : vector<8x256xf32>
    %cst_27 = arith.constant 0.000000e+00 : f32
    %32 = vector.broadcast %cst_27 : f32 to vector<8x256xf32>
    %33 = arith.maximumf %31, %32 : vector<8x256xf32>
    %34 = arith.truncf %33 : vector<8x256xf32> to vector<8x256xbf16>
    %c0_28 = arith.constant 0 : index
    %c0_29 = arith.constant 0 : index
    %35 = vector.load %arg12[%c0_28, %c0_29] : memref<256x256xbf16, #tpu.memory_space<vmem>>, vector<256x256xbf16>
    %cst_30 = arith.constant dense<0.000000e+00> : vector<8x256xf32>
    %36 = tpu.matmul %34, %35, %cst_30 {dimension_numbers = #tpu.dot_dimension_numbers<[1], [0], [0], [1], [0, 0, 1, 1], [], []>} : vector<8x256xbf16>, vector<256x256xbf16>, vector<8x256xf32> -> vector<8x256xf32>
    %c0_31 = arith.constant 0 : index
    %c0_32 = arith.constant 0 : index
    %37 = vector.load %arg13[%c0_31, %c0_32] : memref<1x256xf32, #tpu.memory_space<vmem>>, vector<1x256xf32>
    %38 = vector.broadcast %37 : vector<1x256xf32> to vector<8x256xf32>
    %39 = arith.addf %36, %38 : vector<8x256xf32>
    %cst_33 = arith.constant 0.000000e+00 : f32
    %40 = vector.broadcast %cst_33 : f32 to vector<8x256xf32>
    %41 = arith.maximumf %39, %40 : vector<8x256xf32>
    %42 = arith.truncf %41 : vector<8x256xf32> to vector<8x256xbf16>
    %c0_34 = arith.constant 0 : index
    %c0_35 = arith.constant 0 : index
    %43 = vector.load %arg14[%c0_34, %c0_35] : memref<256x256xbf16, #tpu.memory_space<vmem>>, vector<256x256xbf16>
    %cst_36 = arith.constant dense<0.000000e+00> : vector<8x256xf32>
    %44 = tpu.matmul %42, %43, %cst_36 {dimension_numbers = #tpu.dot_dimension_numbers<[1], [0], [0], [1], [0, 0, 1, 1], [], []>} : vector<8x256xbf16>, vector<256x256xbf16>, vector<8x256xf32> -> vector<8x256xf32>
    %c0_37 = arith.constant 0 : index
    %c0_38 = arith.constant 0 : index
    %45 = vector.load %arg15[%c0_37, %c0_38] : memref<1x256xf32, #tpu.memory_space<vmem>>, vector<1x256xf32>
    %46 = vector.broadcast %45 : vector<1x256xf32> to vector<8x256xf32>
    %47 = arith.addf %44, %46 : vector<8x256xf32>
    %48 = arith.truncf %47 : vector<8x256xf32> to vector<8x256xbf16>
    %c0_39 = arith.constant 0 : index
    %c0_40 = arith.constant 0 : index
    %49 = vector.load %arg16[%c0_39, %c0_40] : memref<256x128xbf16, #tpu.memory_space<vmem>>, vector<256x128xbf16>
    %cst_41 = arith.constant dense<0.000000e+00> : vector<8x128xf32>
    %50 = tpu.matmul %48, %49, %cst_41 {dimension_numbers = #tpu.dot_dimension_numbers<[1], [0], [0], [1], [0, 0, 1, 1], [], []>} : vector<8x256xbf16>, vector<256x128xbf16>, vector<8x128xf32> -> vector<8x128xf32>
    %c0_42 = arith.constant 0 : index
    %c0_43 = arith.constant 0 : index
    %51 = vector.load %arg17[%c0_42, %c0_43] : memref<1x128xf32, #tpu.memory_space<vmem>>, vector<1x128xf32>
    %52 = vector.broadcast %51 : vector<1x128xf32> to vector<8x128xf32>
    %53 = arith.addf %50, %52 : vector<8x128xf32>
    %c0_44 = arith.constant 0 : index
    %c0_45 = arith.constant 0 : index
    %54 = vector.load %arg18[%c0_44, %c0_45] : memref<8x128xf32, #tpu.memory_space<vmem>>, vector<8x128xf32>
    tpu.vector_store %arg18[%c0_44, %c0_45], %53 {strides = array<i32>} : memref<8x128xf32, #tpu.memory_space<vmem>>, vector<8x128xf32>,
    return
  }
  func.func @transform_0(%arg0: i32) -> (i32, i32) {
    %c0_i32 = arith.constant 0 : i32
    %c0_i32_0 = arith.constant 0 : i32
    return %arg0, %c0_i32 : i32, i32
  }
  func.func @transform_1(%arg0: i32) -> (i32, i32) {
    %c0_i32 = arith.constant 0 : i32
    %c0_i32_0 = arith.constant 0 : i32
    return %arg0, %c0_i32 : i32, i32
  }
  func.func @transform_2(%arg0: i32) -> (i32, i32) {
    %c0_i32 = arith.constant 0 : i32
    %c0_i32_0 = arith.constant 0 : i32
    %c0_i32_1 = arith.constant 0 : i32
    return %c0_i32, %c0_i32_0 : i32, i32
  }
  func.func @transform_3(%arg0: i32) -> (i32, i32) {
    %c0_i32 = arith.constant 0 : i32
    %c0_i32_0 = arith.constant 0 : i32
    %c0_i32_1 = arith.constant 0 : i32
    return %c0_i32, %c0_i32_0 : i32, i32
  }
  func.func @transform_4(%arg0: i32) -> (i32, i32) {
    %c0_i32 = arith.constant 0 : i32
    %c0_i32_0 = arith.constant 0 : i32
    %c0_i32_1 = arith.constant 0 : i32
    return %c0_i32, %c0_i32_0 : i32, i32
  }
  func.func @transform_5(%arg0: i32) -> (i32, i32) {
    %c0_i32 = arith.constant 0 : i32
    %c0_i32_0 = arith.constant 0 : i32
    %c0_i32_1 = arith.constant 0 : i32
    return %c0_i32, %c0_i32_0 : i32, i32
  }
  func.func @transform_6(%arg0: i32) -> (i32, i32) {
    %c0_i32 = arith.constant 0 : i32
    %c0_i32_0 = arith.constant 0 : i32
    %c0_i32_1 = arith.constant 0 : i32
    return %c0_i32, %c0_i32_0 : i32, i32
  }
  func.func @transform_7(%arg0: i32) -> (i32, i32) {
    %c0_i32 = arith.constant 0 : i32
    %c0_i32_0 = arith.constant 0 : i32
    %c0_i32_1 = arith.constant 0 : i32
    return %c0_i32, %c0_i32_0 : i32, i32
  }
  func.func @transform_8(%arg0: i32) -> (i32, i32) {
    %c0_i32 = arith.constant 0 : i32
    %c0_i32_0 = arith.constant 0 : i32
    %c0_i32_1 = arith.constant 0 : i32
    return %c0_i32, %c0_i32_0 : i32, i32
  }
  func.func @transform_9(%arg0: i32) -> (i32, i32) {
    %c0_i32 = arith.constant 0 : i32
    %c0_i32_0 = arith.constant 0 : i32
    %c0_i32_1 = arith.constant 0 : i32
    return %c0_i32, %c0_i32_0 : i32, i32
  }
  func.func @transform_10(%arg0: i32) -> (i32, i32) {
    %c0_i32 = arith.constant 0 : i32
    %c0_i32_0 = arith.constant 0 : i32
    %c0_i32_1 = arith.constant 0 : i32
    return %c0_i32, %c0_i32_0 : i32, i32
  }
  func.func @transform_11(%arg0: i32) -> (i32, i32) {
    %c0_i32 = arith.constant 0 : i32
    %c0_i32_0 = arith.constant 0 : i32
    %c0_i32_1 = arith.constant 0 : i32
    return %c0_i32, %c0_i32_0 : i32, i32
  }
  func.func @transform_12(%arg0: i32) -> (i32, i32) {
    %c0_i32 = arith.constant 0 : i32
    %c0_i32_0 = arith.constant 0 : i32
    %c0_i32_1 = arith.constant 0 : i32
    return %c0_i32, %c0_i32_0 : i32, i32
  }
  func.func @transform_13(%arg0: i32) -> (i32, i32) {
    %c0_i32 = arith.constant 0 : i32
    %c0_i32_0 = arith.constant 0 : i32
    %c0_i32_1 = arith.constant 0 : i32
    return %c0_i32, %c0_i32_0 : i32, i32
  }
  func.func @transform_14(%arg0: i32) -> (i32, i32) {
    %c0_i32 = arith.constant 0 : i32
    %c0_i32_0 = arith.constant 0 : i32
    %c0_i32_1 = arith.constant 0 : i32
    return %c0_i32, %c0_i32_0 : i32, i32
  }
  func.func @transform_15(%arg0: i32) -> (i32, i32) {
    %c0_i32 = arith.constant 0 : i32
    %c0_i32_0 = arith.constant 0 : i32
    %c0_i32_1 = arith.constant 0 : i32
    return %c0_i32, %c0_i32_0 : i32, i32
  }
  func.func @transform_16(%arg0: i32) -> (i32, i32) {
    %c0_i32 = arith.constant 0 : i32
    %c0_i32_0 = arith.constant 0 : i32
    %c0_i32_1 = arith.constant 0 : i32
    return %c0_i32, %c0_i32_0 : i32, i32
  }
  func.func @transform_17(%arg0: i32) -> (i32, i32) {
    %c0_i32 = arith.constant 0 : i32
    %c0_i32_0 = arith.constant 0 : i32
    return %arg0, %c0_i32 : i32, i32
  }
}

</mosaic_0001>

<bundles_post_ra>
// kernel: tpu_custom_call.1
= control target key start
LH: loop header
LB: loop body
LE: loop exit
PB: predicated region body
PF: predicated region fallthrough
CT: control target
= control target key end

     0   :  { %s4538_s0 = inlined_call_operand.hbm [shape: bf16[16,32], index: 0, kind: input, shape index: {}]   ;;  %s4539_s1 = inlined_call_operand.hbm [shape: bf16[16,512], index: 1, kind: input, shape index: {}]   ;;  %s4540_s2 = inlined_call_operand.hbm [shape: bf16[32,256], index: 2, kind: input, shape index: {}]   ;;  %s4541_s3 = inlined_call_operand.vmem [shape: f32[1,256], index: 3, kind: input, shape index: {}]   ;;  %s4542_s4 = inlined_call_operand.hbm [shape: bf16[256,256], index: 4, kind: input, shape index: {}]   ;;  %s4543_s5 = inlined_call_operand.vmem [shape: f32[1,256], index: 5, kind: input, shape index: {}]   ;;  %s4544_s6 = inlined_call_operand.hbm [shape: bf16[256,256], index: 6, kind: input, shape index: {}]   ;;  %s4545_s7 = inlined_call_operand.vmem [shape: f32[1,256], index: 7, kind: input, shape index: {}]   ;;  %s4546_s8 = inlined_call_operand.hbm [shape: bf16[256,256], index: 8, kind: input, shape index: {}]   ;;  %s4547_s9 = inlined_call_operand.hbm [shape: bf16[512,256], index: 9, kind: input, shape index: {}]   ;;  %s4548_s10 = inlined_call_operand.vmem [shape: f32[1,256], index: 10, kind: input, shape index: {}]   ;;  %s4549_s11 = inlined_call_operand.hbm [shape: bf16[256,256], index: 11, kind: input, shape index: {}]   ;;  %s4550_s12 = inlined_call_operand.vmem [shape: f32[1,256], index: 12, kind: input, shape index: {}]   ;;  %s4551_s13 = inlined_call_operand.hbm [shape: bf16[256,256], index: 13, kind: input, shape index: {}]   ;;  %s4552_s14 = inlined_call_operand.vmem [shape: f32[1,256], index: 14, kind: input, shape index: {}]   ;;  %s4553_s15 = inlined_call_operand.hbm [shape: bf16[256,128], index: 15, kind: input, shape index: {}]   ;;  %s4554_s16 = inlined_call_operand.vmem [shape: f32[1,128], index: 16, kind: input, shape index: {}]   ;;  %s4555_s17 = inlined_call_operand.hbm [shape: f32[16,128], index: 17, kind: output, shape index: {}]  }
   0x1   :  { %4565 = sst [smem:[#allocation30_spill]] %s4538_s0 }
   0x2   :  { %4566 = sst [smem:[#allocation31_spill]] %s4539_s1 }
   0x3   :  { %4567 = sst [smem:[#allocation32_spill]] %s4540_s2 }
   0x4   :  { %4568 = sst [smem:[#allocation33_spill]] %s4542_s4 }
   0x5   :  { %4569 = sst [smem:[#allocation34_spill]] %s4544_s6 }
   0x6   :  { %4570 = sst [smem:[#allocation35_spill]] %s4546_s8 }
   0x7   :  { %4571 = sst [smem:[#allocation36_spill]] %s4547_s9 }
   0x8   :  { %4572 = sst [smem:[#allocation37_spill]] %s4549_s11 }
   0x9   :  { %4573 = sst [smem:[#allocation38_spill]] %s4551_s13 }
   0xa   :  { %4574 = sst [smem:[#allocation39_spill]] %s4553_s15 }
   0xb   :  { %4575 = sst [smem:[#allocation40_spill]] %s4554_s16 }
   0xc   :  { %4576 = sst [smem:[#allocation41_spill]] %s4555_s17 }
   0xd   :  { %22 = vsyncpa [#allocation3], 0 }
   0xe   :  { %24 = vsyncpa [#allocation3 + $0x1], 0 }
   0xf   :  { %25 = vsyncpa [#allocation6], 0 }
  0x10   :  { %27 = vsyncpa [#allocation6 + $0x1], 0 }
  0x11   :  { %28 = vsyncpa [#allocation9], 0 }
  0x12   :  { %29 = vsyncpa [#allocation12], 0 }
  0x13   :  { %30 = vsyncpa [#allocation15], 0 }
  0x14   :  { %31 = vsyncpa [#allocation18], 0 }
  0x15   :  { %32 = vsyncpa [#allocation4], 0 }
  0x16   :  { %34 = vsyncpa [#allocation4 + $0x1], 0  ;;  %s4153_s24 = smov 0   ;;  %s4155_s25 = smov 0  }
  0x17   :  { %s4157_s26 = smov 0   ;;  %s4159_s27 = smov 0  }
  0x18 LB: > { %4577 = sst [smem:[#allocation28_spill]] %s4041_s26  ;;  %s4047_s28 = smov [#allocation7]   ;;  %s4045_s27 = sphi %s4159_s27, %s4620_s27   ;;  %s4041_s26 = sphi %s4157_s26, %s4617_s26   ;;  %s4037_s25 = sphi %s4155_s25, %s4619_s25   ;;  %s4033_s24 = sphi %s4153_s24, %s4618_s24  }
  0x19   : > { %s450_s29 = sshll.u32 %s4047_s28, 4  ;;  %s4174_s0 = sadd.s32 4294967295, %s4045_s27   ;;  %s451_s29 = int_to_ptr.vmem [resolvable:$true] %s450_s29 }
  0x1a   : > { %p2890_p0 = scmp.ge.s32.totalorder %s4045_s27, 1  ;;  %p4559_p1 = scmp.eq.s32.totalorder %s4174_s0, 0 }
  0x1b   : > { %p438_p2 = scmp.lt.s32.totalorder %s4045_s27, 3  ;;  %s4048_s18 = smov [#allocation8]  }
  0x1c   : > { %s466_s19 = sshll.u32 %s4048_s18, 4  ;;  %s4049_s20 = smov [#allocation11]   ;;  %s4192_s19 = int_to_ptr.vmem [resolvable:$true] %s466_s19 }
  0x1d   : > { %p4179_p3 = pnand %p2890_p0, %p438_p2  ;;  %s498_s21 = sshll.u32 %s4049_s20, 4  ;;  %s4194_s21 = int_to_ptr.vmem [resolvable:$true] %s498_s21 }
  0x1e   : > { %s3704_s23 = scalar_lea.vmem %s451_s29, 512  ;;  %p3712_p11 = scmp.lt.s32.totalorder %s451_s29, %s451_s29 }
  0x1f   : > { %s4578_s30 = scalar_select %p4179_p3, 1, 0 }
  0x20   : > { %p3232_p5 = pneg %p4179_p3  ;;  %p3705_p8 = scmp.ne.s32.totalorder %s451_s29, %s3704_s23 }
  0x21   : > { %p3713_p12 = scmp.lt.s32.totalorder %s3704_s23, %s3704_s23 }
  0x22   : > { %p4188_p6 = pnand %p3232_p5, %p4559_p1 }
  0x23   : > { %p3714_p13 = por %p3713_p12, %p3712_p11 }
  0x24   : > { %p4198_p7 = pneg %p4188_p6 }
  0x26   : > { %p3707_p9 = pnand %p3705_p8, %p4198_p7 }
  0x28   : > { %p3708_p10 = pneg %p3707_p9 }
  0x2a   : > { %p3715_p0 = pnand %p3714_p13, %p3708_p10 }
  0x2c   : > { %3718 = shalt.err (!%p3715_p0)
}
  0x2d   : > { %s4050_s28 = smov 128   ;;  %s4051_s18 = smov 8  }
  0x2e   : > { %s4581_s2 = sld [smem:[#allocation32_spill]]  ;;  %s3730_s16 = scalar_lea.vmem %s4192_s19, 4096 }
  0x2f   : > { %p3731_p2 = scmp.ne.s32.totalorder %s4192_s19, %s3730_s16  ;;  %p3738_p9 = scmp.lt.s32.totalorder %s4192_s19, %s4192_s19 }
  0x30   : > { %p3739_p10 = scmp.lt.s32.totalorder %s3730_s16, %s3730_s16 }
  0x31   : > { %p3733_p5 = pnand %p3731_p2, %p4198_p7 }
  0x32   : > { %p3740_p11 = por %p3739_p10, %p3738_p9 }
  0x33   : > { %p3734_p8 = pneg %p3733_p5 }
  0x34   : > { %3235 = dma.hbm_to_vmem [thread:$0]  (!%p4188_p6), %s4581_s2, 512, %s451_s29, [#allocation6], %s4050_s28, %s4050_s28, %s4051_s18  }
  0x35   : > { %p3741_p12 = pnand %p3740_p11, %p3734_p8 }
  0x37   : > { %3744 = shalt.err (!%p3741_p12)
}
  0x38   : > { %s4582_s4 = sld [smem:[#allocation33_spill]]  ;;  %s3756_s29 = scalar_lea.vmem %s4194_s21, 4096 }
  0x39   : > { %p3757_p13 = scmp.ne.s32.totalorder %s4194_s21, %s3756_s29  ;;  %p3764_p5 = scmp.lt.s32.totalorder %s4194_s21, %s4194_s21 }
  0x3a   : > { %p3765_p8 = scmp.lt.s32.totalorder %s3756_s29, %s3756_s29 }
  0x3b   : > { %p3759_p0 = pnand %p3757_p13, %p4198_p7 }
  0x3c   : > { %p3766_p9 = por %p3765_p8, %p3764_p5 }
  0x3d   : > { %p3760_p2 = pneg %p3759_p0 }
  0x3e   : > { %3238 = dma.hbm_to_vmem [thread:$0]  (!%p4188_p6), %s4582_s4, 4096, %s4192_s19, [#allocation9], %s4050_s28, %s4050_s28, %s4051_s18  }
  0x3f   : > { %p3767_p10 = pnand %p3766_p9, %p3760_p2 }
  0x41   : > { %3770 = shalt.err (!%p3767_p10)
}
  0x42   : > { %s4583_s8 = sld [smem:[#allocation35_spill]]  ;;  %s4052_s19 = smov [#allocation14]  }
  0x43   : > { %s527_s23 = sshll.u32 %s4052_s19, 4  ;;  %s4053_s17 = smov [#allocation10]   ;;  %s528_s23 = int_to_ptr.vmem [resolvable:$true] %s527_s23 }
  0x44   : > { %s482_s2 = sshll.u32 %s4053_s17, 4  ;;  %s3782_s29 = scalar_lea.vmem %s528_s23, 4096  ;;  %s483_s2 = int_to_ptr.vmem [resolvable:$true] %s482_s2 }
  0x45   : > { %p3783_p11 = scmp.ne.s32.totalorder %s528_s23, %s3782_s29  ;;  %p3790_p0 = scmp.lt.s32.totalorder %s528_s23, %s528_s23 }
  0x46   : > { %p3791_p2 = scmp.lt.s32.totalorder %s3782_s29, %s3782_s29 }
  0x47   : > { %p3785_p12 = pnand %p3783_p11, %p4198_p7 }
  0x48   : > { %3244 = dma.hbm_to_vmem [thread:$0]  (!%p4188_p6), %s4583_s8, 4096, %s4194_s21, [#allocation12], %s4050_s28, %s4050_s28, %s4051_s18  }
  0x49   : > { %p3786_p13 = pneg %p3785_p12  ;;  %p3792_p5 = por %p3791_p2, %p3790_p0 }
  0x4b   : > { %p3793_p8 = pnand %p3792_p5, %p3786_p13 }
  0x4d   : > { %3796 = shalt.err (!%p3793_p8)
}
  0x4e   : > { %s4584_s11 = sld [smem:[#allocation37_spill]]  ;;  %s3808_s20 = scalar_lea.vmem %s483_s2, 4096 }
  0x4f   : > { %p3809_p9 = scmp.ne.s32.totalorder %s483_s2, %s3808_s20  ;;  %p3816_p12 = scmp.lt.s32.totalorder %s483_s2, %s483_s2 }
  0x50   : > { %p3817_p0 = scmp.lt.s32.totalorder %s3808_s20, %s3808_s20 }
  0x51   : > { %p3811_p10 = pnand %p3809_p9, %p4198_p7 }
  0x52   : > { %p3818_p13 = por %p3817_p0, %p3816_p12 }
  0x53   : > { %p3812_p11 = pneg %p3811_p10 }
  0x54   : > { %3250 = dma.hbm_to_vmem [thread:$0]  (!%p4188_p6), %s4584_s11, 4096, %s528_s23, [#allocation15], %s4050_s28, %s4050_s28, %s4051_s18  }
  0x55   : > { %p3819_p2 = pnand %p3818_p13, %p3812_p11 }
  0x57   : > { %3822 = shalt.err (!%p3819_p2)
}
  0x58   : > { %s4585_s6 = sld [smem:[#allocation34_spill]]  ;;  %s4054_s23 = smov [#allocation13]  }
  0x59   : > { %s511_s29 = sshll.u32 %s4054_s23, 4  ;;  %s4055_s21 = smov [#allocation16]   ;;  %s512_s29 = int_to_ptr.vmem [resolvable:$true] %s511_s29 }
  0x5a   : > { %s543_s16 = sshll.u32 %s4055_s21, 4  ;;  %s3834_s4 = scalar_lea.vmem %s512_s29, 8192  ;;  %s544_s16 = int_to_ptr.vmem [resolvable:$true] %s543_s16 }
  0x5b   : > { %p3835_p5 = scmp.ne.s32.totalorder %s512_s29, %s3834_s4  ;;  %p3842_p10 = scmp.lt.s32.totalorder %s512_s29, %s512_s29 }
  0x5c   : > { %p3843_p11 = scmp.lt.s32.totalorder %s3834_s4, %s3834_s4 }
  0x5d   : > { %p3837_p8 = pnand %p3835_p5, %p4198_p7 }
  0x5e   : > { %3241 = dma.hbm_to_vmem [thread:$0]  (!%p4188_p6), %s4585_s6, 4096, %s483_s2, [#allocation9], %s4050_s28, %s4050_s28, %s4051_s18  }
  0x5f   : > { %p3838_p9 = pneg %p3837_p8  ;;  %p3844_p12 = por %p3843_p11, %p3842_p10 }
  0x61   : > { %p3845_p0 = pnand %p3844_p12, %p3838_p9 }
  0x63   : > { %3848 = shalt.err (!%p3845_p0)
}
  0x64   : > { %s4586_s9 = sld [smem:[#allocation36_spill]]  ;;  %s3860_s19 = scalar_lea.vmem %s544_s16, 4096 }
  0x65   : > { %p3861_p13 = scmp.ne.s32.totalorder %s544_s16, %s3860_s19  ;;  %p3868_p8 = scmp.lt.s32.totalorder %s544_s16, %s544_s16 }
  0x66   : > { %p3869_p10 = scmp.lt.s32.totalorder %s3860_s19, %s3860_s19 }
  0x67   : > { %p3863_p2 = pnand %p3861_p13, %p4198_p7 }
  0x68   : > { %p3870_p9 = por %p3869_p10, %p3868_p8 }
  0x69   : > { %p3864_p5 = pneg %p3863_p2 }
  0x6a   : > { %3247 = dma.hbm_to_vmem [thread:$0]  (!%p4188_p6), %s4586_s9, 8192, %s512_s29, [#allocation12], %s4050_s28, %s4050_s28, %s4051_s18  }
  0x6b   : > { %p3871_p11 = pnand %p3870_p9, %p3864_p5 }
  0x6d   : > { %3874 = shalt.err (!%p3871_p11)
}
  0x6e   : > { %s4587_s13 = sld [smem:[#allocation38_spill]]  ;;  %s4056_s23 = smov [#allocation17]  }
  0x6f   : > { %s559_s29 = sshll.u32 %s4056_s23, 4  ;;  %s560_s29 = int_to_ptr.vmem [resolvable:$true] %s559_s29 }
  0x70   : > { %s3886_s21 = scalar_lea.vmem %s560_s29, 2048  ;;  %p3894_p2 = scmp.lt.s32.totalorder %s560_s29, %s560_s29 }
  0x71   : > { %p3887_p12 = scmp.ne.s32.totalorder %s560_s29, %s3886_s21  ;;  %p3895_p5 = scmp.lt.s32.totalorder %s3886_s21, %s3886_s21 }
  0x73   : > { %p3889_p0 = pnand %p3887_p12, %p4198_p7  ;;  %p3896_p8 = por %p3895_p5, %p3894_p2 }
  0x74   : > { %3253 = dma.hbm_to_vmem [thread:$0]  (!%p4188_p6), %s4587_s13, 4096, %s544_s16, [#allocation15], %s4050_s28, %s4050_s28, %s4051_s18  }
  0x75   : > { %p3890_p13 = pneg %p3889_p0 }
  0x77   : > { %p3897_p10 = pnand %p3896_p8, %p3890_p13 }
  0x79   : > { %3900 = shalt.err (!%p3897_p10)
}
  0x7a   : > { %s4057_s2 = smov 64   ;;  %s4058_s22 = smov 4  }
  0x7b   : > { %s4588_s15 = sld [smem:[#allocation39_spill]]  ;;  %s2889_s16 = sadd.s32 4294967294, %s4045_s27  }
  0x7c   : > { %s4291_s20 = sadd.s32 1, %s4045_s27   ;;  %s47_s4 = sadd.s32 1, %s4041_s26 }
  0x7d   : > { %s44_s19 = ssub.s32 %s4045_s27, %s4291_s20  ;;  %p54_p9 = scmp.ne.s32.totalorder %s4041_s26, %s4037_s25 }
  0x7e   : > { %p45_p7 = scmp.eq.s32.totalorder %s44_s19, 0  ;;  %p55_p11 = scmp.eq.s32.totalorder %s4045_s27, 0 }
  0x7f   : > { %p60_p12 = scmp.ne.s32.totalorder %s4037_s25, %s4033_s24  ;;  %p425_p13 = scmp.eq.s32.totalorder %s4174_s0, 1 }
  0x80   : > { %s4302_s17 = scalar_select %p45_p7, %s4041_s26, %s47_s4  }
  0x81   : > { %3256 = dma.hbm_to_vmem [thread:$0]  (!%p4188_p6), %s4588_s15, 2048, %s560_s29, [#allocation18], %s4057_s2, %s4057_s2, %s4058_s22  }
  0x82   : > { %4589 = sst [smem:[#allocation29_spill]] %s4302_s17  ;;  %p4304_p0 = por %p55_p11, %p54_p9 }
  0x83   : > { %p4310_p6 = por %p4559_p1, %p60_p12  ;;  %p431_p2 = scmp.eq.s32.totalorder %s2889_s16, 1 }
  0x84   : > { %p3276_p5 = scmp.lt.s32.totalorder %s4045_s27, 2  ;;  %s4317_s29 = sand.u32 1, %s4041_s26  }
  0x85   : > { %s4591_s23 = scalar_select %p4310_p6, 1, 0 }
  0x86   : > { %p4319_p8 = por %p425_p13, %p54_p9  ;;  %p4323_p10 = por %p431_p2, %p60_p12 }
  0x87   : > { %s2900_s22 = sshll.u32 %s4317_s29, 2  ;;  %s2901_s28 = sshll.u32 %s4045_s27, 6 }
  0x88   : > { %s4592_s21 = scalar_select %p4319_p8, 1, 0 }
  0x89   : > { %s4593_s2 = scalar_select %p4323_p10, 1, 0 }
  0x8a   : > { %s4594_s4 = sld [smem:[#allocation30_spill]]  ;;  %s580_s6 = scalar_lea.vmem [#allocation2], %s2900_s22 }
  0x8b   : > { %s587_s8 = sshll.u32 %s580_s6, 4  ;;  %p4338_p7 = pnand %p3276_p5, %p4304_p0  ;;  %s4334_s8 = int_to_ptr.vmem [resolvable:$true] %s587_s8 }
  0x8c   : > { %s577_s15 = scalar_lea.sflag [#allocation3], %s4317_s29 }
  0x8d   : > { %p3903_p11 = pneg %p4338_p7 }
  0x90   : > { %s4332_s16 = scalar_lea.hbm %s4594_s4, %s2901_s28  ;;  %s3906_s1 = scalar_lea.hbm %s4594_s4, 128 }
  0x91   : > { %s3901_s18 = scalar_lea.hbm %s4332_s16, 64  ;;  %p3907_p0 = scmp.lt.s32.totalorder %s4332_s16, %s4594_s4 }
  0x92   : > { %p3902_p9 = scmp.ne.s32.totalorder %s4332_s16, %s3901_s18  ;;  %p3908_p2 = scmp.lt.s32.totalorder %s3906_s1, %s3901_s18 }
  0x94   : > { %p3904_p12 = pnand %p3903_p11, %p3902_p9  ;;  %p3909_p5 = por %p3908_p2, %p3907_p0 }
  0x96   : > { %p3905_p13 = pneg %p3904_p12 }
  0x98   : > { %p3910_p4 = pnand %p3909_p5, %p3905_p13 }
  0x9a   : > { %3913 = shalt.err (!%p3910_p4)
}
  0x9b   : > { %s3914_s11 = scalar_lea.vmem %s4334_s8, 64  ;;  %s4059_s6 = smov [#allocation2]  }
  0x9c   : > { %p3915_p1 = scmp.ne.s32.totalorder %s4334_s8, %s3914_s11  ;;  %s3919_s22 = sshll.u32 %s4059_s6, 4  ;;  %s3920_s22 = int_to_ptr.vmem [resolvable:$false] %s3919_s22 }
  0x9d   : > { %s3921_s13 = scalar_lea.vmem %s3920_s22, 128  ;;  %p3922_p10 = scmp.lt.s32.totalorder %s4334_s8, %s3920_s22 }
  0x9e   : > { %p3917_p9 = pnand %p3915_p1, %p3903_p11  ;;  %p3923_p8 = scmp.lt.s32.totalorder %s3921_s13, %s3914_s11 }
  0xa0   : > { %p3918_p12 = pneg %p3917_p9  ;;  %p3924_p6 = por %p3923_p8, %p3922_p10 }
  0xa2   : > { %p3925_p0 = pnand %p3924_p6, %p3918_p12 }
  0xa4   : > { %3928 = shalt.err (!%p3925_p0)
}
  0xa5   : > { %3260 = dma.hbm_to_vmem [thread:$0]  (!%p4338_p7), %s4332_s16, 64, %s4334_s8, %s577_s15  }
  0xa6   : > { %s3171_s18 = sshll.u32 %s4045_s27, 8  ;;  %s4596_s19 = sld [smem:[#allocation31_spill]] }
  0xa7   : > { %s4597_s22 = sshll.u32 %s4317_s29, 4  ;;  %s4598_s4 = sand.u32 1, %s4045_s27  }
  0xa8   : > { %s598_s11 = scalar_lea.vmem [#allocation5], %s4597_s22  ;;  %s595_s17 = scalar_lea.sflag [#allocation6], %s4598_s4 }
  0xa9   : > { %s606_s13 = sshll.u32 %s598_s11, 4  ;;  %s607_s13 = int_to_ptr.vmem [resolvable:$true] %s606_s13 }
  0xac   : > { %s4373_s6 = scalar_lea.hbm %s4596_s19, %s3171_s18  ;;  %s3934_s16 = scalar_lea.hbm %s4596_s19, 512 }
  0xad   : > { %s3929_s26 = scalar_lea.hbm %s4373_s6, 256  ;;  %p3935_p8 = scmp.lt.s32.totalorder %s4373_s6, %s4596_s19 }
  0xae   : > { %p3930_p1 = scmp.ne.s32.totalorder %s4373_s6, %s3929_s26  ;;  %p3936_p10 = scmp.lt.s32.totalorder %s3934_s16, %s3929_s26 }
  0xb0   : > { %p3932_p4 = pnand %p3930_p1, %p3903_p11  ;;  %p3937_p13 = por %p3936_p10, %p3935_p8 }
  0xb2   : > { %p3933_p6 = pneg %p3932_p4 }
  0xb4   : > { %p3938_p2 = pnand %p3937_p13, %p3933_p6 }
  0xb6   : > { %3941 = shalt.err (!%p3938_p2)
}
  0xb7   : > { %s3942_s1 = scalar_lea.vmem %s607_s13, 256  ;;  %s4060_s4 = smov [#allocation5]  }
  0xb8   : > { %p3943_p5 = scmp.ne.s32.totalorder %s607_s13, %s3942_s1  ;;  %s3947_s28 = sshll.u32 %s4060_s4, 4  ;;  %s3948_s28 = int_to_ptr.vmem [resolvable:$false] %s3947_s28 }
  0xb9   : > { %s3949_s22 = scalar_lea.vmem %s3948_s28, 512  ;;  %p3950_p0 = scmp.lt.s32.totalorder %s607_s13, %s3948_s28 }
  0xba   : > { %p3945_p9 = pnand %p3943_p5, %p3903_p11  ;;  %p3951_p1 = scmp.lt.s32.totalorder %s3949_s22, %s3942_s1 }
  0xbc   : > { %p3946_p12 = pneg %p3945_p9  ;;  %p3952_p4 = por %p3951_p1, %p3950_p0 }
  0xbe   : > { %p3953_p3 = pnand %p3952_p4, %p3946_p12 }
  0xc0   : > { %3956 = shalt.err (!%p3953_p3)
}
  0xc1   : > { %3263 = dma.hbm_to_vmem [thread:$0]  (!%p4338_p7), %s4373_s6, 256, %s607_s13, %s595_s17  }
  0xc2   : > { %p4599_p6 = scmp.ne.s32.totalorder %s4578_s30, 0 }
  0xc3   : > { %s4400_s26 = sand.u32 (!%p4599_p6), 1, %s4037_s25   ;;  %p4600_p11 = scmp.ne.s32.totalorder (!%p4599_p6), %s4591_s23, 0 }
  0xc4   : > { %615 = sbr.rel (%p4599_p6) target bundleno = 1652 (0x674), region = 88  ;;  %s2906_s11 = sshll.u32 (!%p4599_p6), %s4400_s26, 2 }
  0xc5   : > { %s618_s8 = scalar_lea.sflag (!%p4599_p6), [#allocation3], %s4400_s26  ;;  %s4404_s15 = scalar_lea.vmem (!%p4599_p6), [#allocation2], %s2906_s11 }
  0xc9   : > { %4000 = dma.done.wait (%p4600_p11), %s618_s8, 64  }
  0xca   : > { %4002 = vsyncadd (%p4600_p11), %s618_s8, 4294967232  ;;  %s626_s9 = sand.u32 1, %s4174_s0   ;;  %s2907_s30 = sshll.u32 %s4400_s26, 4 }
  0xcb   : > { %s627_s17 = scalar_lea.sflag [#allocation6], %s626_s9  ;;  %s4412_s6 = scalar_lea.vmem [#allocation5], %s2907_s30 }
  0xcc   : > { %4004 = dma.done.wait (%p4600_p11), %s627_s17, 256  }
  0xcd   : > { %4006 = vsyncadd (%p4600_p11), %s627_s17, 4294967040  ;;  %p4601_p3 = scmp.eq.s32.totalorder %s4174_s0, 0 }
  0xcf   : > { %4008 = dma.done.wait (%p4601_p3), [#allocation6], 512   ;;  %p4602_p7 = pmov %p4601_p3 }
  0xd0   : > { %p4603_p8 = pmov %p4601_p3 }
  0xd1   : > { %4010 = vsyncadd (%p4602_p7), [#allocation6], 4294966784 }
  0xd2   : > { %4012 = dma.done.wait (%p4603_p8), [#allocation9], 8192   ;;  %p4604_p10 = pmov %p4601_p3 }
  0xd3   : > { %p4605_p13 = pmov %p4601_p3 }
  0xd4   : > { %4014 = vsyncadd (%p4604_p10), [#allocation9], 4294959104 }
  0xd5   : > { %4016 = dma.done.wait (%p4605_p13), [#allocation12], 12288   ;;  %p4606_p2 = pmov %p4601_p3 }
  0xd7   : > { %4018 = vsyncadd (%p4606_p2), [#allocation12], 4294955008  ;;  %p4607_p5 = pmov %p4606_p2 }
  0xd8   : > { %p4608_p9 = pmov %p4606_p2 }
  0xd9   : > { %4020 = dma.done.wait (%p4607_p5), [#allocation15], 8192  }
  0xda   : > { %4022 = vsyncadd (%p4608_p9), [#allocation15], 4294959104  ;;  %p4609_p12 = pmov %p4606_p2 }
  0xdb   : > { %p4610_p0 = pmov %p4606_p2 }
  0xdc   : > { %4024 = dma.done.wait (%p4609_p12), [#allocation18], 2048  }
  0xdd   : > { %4026 = vsyncadd (%p4610_p0), [#allocation18], 4294965248  ;;  %v4061_v0 = vmov 0   ;;  %v3331_v1 = vld [vmem:[#allocation7 + $0x14] ss:$8 sps:$4 sm:$0xff]   ;;  %vm756_vm0 = vcmask 261120  }
  0xde   : > { %792 = vmatprep.mubr.bf16.mxu0 %v4061_v0  ;;  %v3333_v2 = vld [vmem:[#allocation7 + $0x10] ss:$8 sps:$4 sm:$0xff]   ;;  %772 = vmatprep.subr.bf16.mxu0 %v3331_v1  ;;  %v3334_v3 = vld [vmem:[#allocation7 + $0x4] ss:$8 sps:$4 sm:$0xff]   ;;  %v3336_v4 = vld [vmem:[#allocation7] ss:$8 sps:$4 sm:$0xff]  }
  0xdf   : > { %773 = vmatpush1.bf16.msra.mxu0 %v3333_v2  ;;  %v3337_v5 = vld [vmem:[#allocation8 + $0x74] ss:$8 sps:$4 sm:$0xff]   ;;  %v3339_v6 = vld [vmem:[#allocation8 + $0x70] ss:$8 sps:$4 sm:$0xff]   ;;  %v3340_v7 = vld [vmem:[#allocation8 + $0x64] ss:$8 sps:$4 sm:$0xff]   ;;  %v726_v2 = vlaneseq }
  0xe0   : > { %774 = vmatprep.subr.bf16.mxu0 %v3334_v3  ;;  %1009 = vmatprep.subr.bf16.mxu1 %v3337_v5  ;;  %v719_v8 = vld [vmem:[%s4404_s15] sm:$0xf]  ;;  %v3342_v9 = vld [vmem:[#allocation8 + $0x60] ss:$8 sps:$4 sm:$0xff]   ;;  %v3346_v12 = vld [vmem:[#allocation8 + $0x44] ss:$8 sps:$4 sm:$0xff]  }
  0xe1   : > { %1010 = vmatpush1.bf16.msra.mxu1 %v3339_v6  ;;  %v3343_v10 = vld [vmem:[#allocation8 + $0x54] ss:$8 sps:$4 sm:$0xff]   ;;  %v3345_v11 = vld [vmem:[#allocation8 + $0x50] ss:$8 sps:$4 sm:$0xff]   ;;  %v3348_v13 = vld [vmem:[#allocation8 + $0x40] ss:$8 sps:$4 sm:$0xff]  }
  0xe2   : > { %1011 = vmatprep.subr.bf16.mxu1 %v3340_v7  ;;  %v3349_v14 = vld [vmem:[#allocation8 + $0x34] ss:$8 sps:$4 sm:$0xff]   ;;  %v3351_v15 = vld [vmem:[#allocation8 + $0x30] ss:$8 sps:$4 sm:$0xff]   ;;  %v3352_v16 = vld [vmem:[#allocation8 + $0x24] ss:$8 sps:$4 sm:$0xff]  }
  0xe3   : > { %775 = vmatpush1.bf16.msra.mxu0 %v3336_v4  ;;  %v3354_v17 = vld [vmem:[#allocation8 + $0x20] ss:$8 sps:$4 sm:$0xff]   ;;  %v3355_v18 = vld [vmem:[#allocation8 + $0x14] ss:$8 sps:$4 sm:$0xff]   ;;  %v3357_v19 = vld [vmem:[#allocation8 + $0x10] ss:$8 sps:$4 sm:$0xff]  }
  0xe4   : > { %v3358_v20 = vld [vmem:[#allocation8 + $0x4] ss:$8 sps:$4 sm:$0xff]   ;;  %v3360_v21 = vld [vmem:[#allocation8] ss:$8 sps:$4 sm:$0xff]   ;;  %v3361_v22 = vld [vmem:[#allocation8 + $0xf4] ss:$8 sps:$4 sm:$0xff]  }
  0xe5   : > { %1012 = vmatpush1.bf16.msra.mxu1 %v3342_v9  ;;  %v3363_v23 = vld [vmem:[#allocation8 + $0xf0] ss:$8 sps:$4 sm:$0xff]   ;;  %v3364_v24 = vld [vmem:[#allocation8 + $0xe4] ss:$8 sps:$4 sm:$0xff]   ;;  %v3366_v25 = vld [vmem:[#allocation8 + $0xe0] ss:$8 sps:$4 sm:$0xff]  }
  0xe6   : > { %2921 = vmatmul.mubr.msk.bf16.vlgmr.msra.gmra.mxu0 %vm756_vm0, %v719_v8  ;;  %1013 = vmatprep.subr.bf16.mxu1 %v3343_v10  ;;  %v3367_v26 = vld [vmem:[#allocation8 + $0xd4] ss:$8 sps:$4 sm:$0xff]   ;;  %v3369_v27 = vld [vmem:[#allocation8 + $0xd0] ss:$8 sps:$4 sm:$0xff]   ;;  %v3370_v28 = vld [vmem:[#allocation8 + $0xc4] ss:$8 sps:$4 sm:$0xff]  }
  0xe7   : > { %v3372_v29 = vld [vmem:[#allocation8 + $0xc0] ss:$8 sps:$4 sm:$0xff]   ;;  %v3373_v30 = vld [vmem:[#allocation8 + $0xb4] ss:$8 sps:$4 sm:$0xff]   ;;  %v3375_v31 = vld [vmem:[#allocation8 + $0xb0] ss:$8 sps:$4 sm:$0xff]  }
  0xe8   : > { %v3376_v32 = vld [vmem:[#allocation8 + $0xa4] ss:$8 sps:$4 sm:$0xff]   ;;  %v3378_v33 = vld [vmem:[#allocation8 + $0xa0] ss:$8 sps:$4 sm:$0xff]   ;;  %v3379_v34 = vld [vmem:[#allocation8 + $0x94] ss:$8 sps:$4 sm:$0xff]  }
  0xe9   : > { %1014 = vmatpush1.bf16.msra.mxu1 %v3345_v11  ;;  %v3381_v35 = vld [vmem:[#allocation8 + $0x90] ss:$8 sps:$4 sm:$0xff]   ;;  %v3382_v36 = vld [vmem:[#allocation8 + $0x84] ss:$8 sps:$4 sm:$0xff]   ;;  %v3384_v37 = vld [vmem:[#allocation8 + $0x80] ss:$8 sps:$4 sm:$0xff]  }
  0xea   : > { %1015 = vmatprep.subr.bf16.mxu1 %v3346_v12  ;;  %v3385_v38 = vld [vmem:[#allocation10 + $0x70] ss:$8 sps:$4 sm:$0xff]   ;;  %v3387_v39 = vld [vmem:[#allocation10 + $0x74] ss:$8 sps:$4 sm:$0xff]   ;;  %v3390_v40 = vld [vmem:[#allocation10 + $0x64] ss:$8 sps:$4 sm:$0xff]  }
  0xeb   : > { %1258 = vmatprep.subr.bf16.mxu0 %v3387_v39  ;;  %v3388_v41 = vld [vmem:[#allocation10 + $0x60] ss:$8 sps:$4 sm:$0xff]   ;;  %v3393_v42 = vld [vmem:[#allocation10 + $0x54] ss:$8 sps:$4 sm:$0xff]   ;;  %v3391_v43 = vld [vmem:[#allocation10 + $0x50] ss:$8 sps:$4 sm:$0xff]  }
  0xec   : > { %1259 = vmatpush1.bf16.msra.mxu0 %v3385_v38  ;;  %v3396_v44 = vld [vmem:[#allocation10 + $0x44] ss:$8 sps:$4 sm:$0xff]   ;;  %v3394_v45 = vld [vmem:[#allocation10 + $0x40] ss:$8 sps:$4 sm:$0xff]   ;;  %v3399_v46 = vld [vmem:[#allocation10 + $0x34] ss:$8 sps:$4 sm:$0xff]  }
  0xed   : > { %1016 = vmatpush1.bf16.msra.mxu1 %v3348_v13  ;;  %1260 = vmatprep.subr.bf16.mxu0 %v3390_v40  ;;  %v3397_v47 = vld [vmem:[#allocation10 + $0x30] ss:$8 sps:$4 sm:$0xff]   ;;  %v3402_v48 = vld [vmem:[#allocation10 + $0x24] ss:$8 sps:$4 sm:$0xff]   ;;  %v3400_v49 = vld [vmem:[#allocation10 + $0x20] ss:$8 sps:$4 sm:$0xff]  }
  0xee   : > { %1017 = vmatprep.subr.bf16.mxu1 %v3349_v14  ;;  %v3405_v50 = vld [vmem:[#allocation10 + $0x14] ss:$8 sps:$4 sm:$0xff]   ;;  %v3403_v51 = vld [vmem:[#allocation10 + $0x10] ss:$8 sps:$4 sm:$0xff]   ;;  %v3408_v52 = vld [vmem:[#allocation10 + $0x4] ss:$8 sps:$4 sm:$0xff]  }
  0xef   : > { %v3406_v53 = vld [vmem:[#allocation10] ss:$8 sps:$4 sm:$0xff]   ;;  %v3411_v54 = vld [vmem:[#allocation10 + $0xf4] ss:$8 sps:$4 sm:$0xff]   ;;  %v3409_v55 = vld [vmem:[#allocation10 + $0xf0] ss:$8 sps:$4 sm:$0xff]  }
  0xf0   : > { %1261 = vmatpush1.bf16.msra.mxu0 %v3388_v41  ;;  %v3414_v56 = vld [vmem:[#allocation10 + $0xe4] ss:$8 sps:$4 sm:$0xff]   ;;  %v3412_v57 = vld [vmem:[#allocation10 + $0xe0] ss:$8 sps:$4 sm:$0xff]   ;;  %v3417_v58 = vld [vmem:[#allocation10 + $0xd4] ss:$8 sps:$4 sm:$0xff]  }
  0xf1   : > { %1018 = vmatpush1.bf16.msra.mxu1 %v3351_v15  ;;  %1262 = vmatprep.subr.bf16.mxu0 %v3393_v42  ;;  %v3415_v59 = vld [vmem:[#allocation10 + $0xd0] ss:$8 sps:$4 sm:$0xff]   ;;  %v3420_v60 = vld [vmem:[#allocation10 + $0xc4] ss:$8 sps:$4 sm:$0xff]   ;;  %v3418_v61 = vld [vmem:[#allocation10 + $0xc0] ss:$8 sps:$4 sm:$0xff]  }
  0xf2   : > { %1019 = vmatprep.subr.bf16.mxu1 %v3352_v16  ;;  %v3423_v62 = vld [vmem:[#allocation10 + $0xb4] ss:$8 sps:$4 sm:$0xff]   ;;  %v3421_v63 = vld [vmem:[#allocation10 + $0xb0] ss:$8 sps:$4 sm:$0xff]   ;;  %v3426_v0 = vld [vmem:[#allocation10 + $0xa4] ss:$8 sps:$4 sm:$0xff]  }
  0xf3   : > { %v3424_v1 = vld [vmem:[#allocation10 + $0xa0] ss:$8 sps:$4 sm:$0xff]   ;;  %v727_v3 = vshrl.u32 %v726_v2, 7  ;;  %v724_v5 = vld [vmem:[%s4541_s3] sm:$0x3]  ;;  %s2916_s9 = sshll.u32 %s4400_s26, 3 }
  0xf4   : > { %1263 = vmatpush1.bf16.msra.mxu0 %v3391_v43  ;;  %v3474_v38 = vld [vmem:[#allocation13 + $0x4] ss:$8 sps:$4 sm:$0xff]   ;;  %v3472_v39 = vld [vmem:[#allocation13] ss:$8 sps:$4 sm:$0xff]   ;;  %v3480_v40 = vld [vmem:[#allocation13 + $0xf4] ss:$8 sps:$4 sm:$0xff]  }
  0xf5   : > { %1020 = vmatpush1.bf16.msra.mxu1 %v3354_v17  ;;  %1264 = vmatprep.subr.bf16.mxu0 %v3396_v44  ;;  %v4439_v4 = vsub.s32 0, %v727_v3  ;;  %v4444_v6 = vsub.s32 1, %v727_v3  ;;  %v3478_v41 = vld [vmem:[#allocation13 + $0xf0] ss:$8 sps:$4 sm:$0xff]   ;;  %v3486_v42 = vld [vmem:[#allocation13 + $0xe4] ss:$8 sps:$4 sm:$0xff]  }
  0xf6   : > { %1021 = vmatprep.subr.bf16.mxu1 %v3355_v18  ;;  %v3484_v43 = vld [vmem:[#allocation13 + $0xe0] ss:$8 sps:$4 sm:$0xff]   ;;  %v3492_v44 = vld [vmem:[#allocation13 + $0xd4] ss:$8 sps:$4 sm:$0xff]   ;;  %s3168_s23 = sshll.u32 %s4174_s0, 7  ;;  %s717_s13 = scalar_lea.vmem [#allocation19], %s2916_s9 }
  0xf7   : > { %v729_v7 = vrot.slane %v724_v5, %v4439_v4  ;;  %v733_v8 = vrot.slane %v724_v5, %v4444_v6  ;;  %v3542_v2 = vld [vmem:[#allocation11 + $0x40] ss:$8 sps:$4 sm:$0xff]   ;;  %v3547_v3 = vld [vmem:[#allocation11 + $0x34] ss:$8 sps:$4 sm:$0xff]   ;;  %v3545_v5 = vld [vmem:[#allocation11 + $0x30] ss:$8 sps:$4 sm:$0xff]  }
  0xf8   : > { %1265 = vmatpush1.bf16.msra.mxu0 %v3394_v45  ;;  %v3490_v45 = vld [vmem:[#allocation13 + $0xd0] ss:$8 sps:$4 sm:$0xff]   ;;  %s2720_s16 = sshll.u32 %s717_s13, 4  ;;  %s4612_s1 = sld [smem:[#allocation41_spill]]  ;;  %s2721_s16 = int_to_ptr.vmem [resolvable:$true] %s2720_s16 }
  0xf9   : > { %1022 = vmatpush1.bf16.msra.mxu1 %v3357_v19  ;;  %1266 = vmatprep.subr.bf16.mxu0 %v3399_v46  ;;  %v3429_v19 = vld [vmem:[#allocation10 + $0x94] ss:$8 sps:$4 sm:$0xff]   ;;  %v3498_v46 = vld [vmem:[#allocation13 + $0xc4] ss:$8 sps:$4 sm:$0xff]   ;;  %s2707_s28 = scalar_lea.sflag [#allocation4], %s4400_s26  ;;  %s3957_s22 = scalar_lea.vmem %s2721_s16, 128 }
  0xfa   : > { %1023 = vmatprep.subr.bf16.mxu1 %v3358_v20  ;;  %v3427_v20 = vld [vmem:[#allocation10 + $0x90] ss:$8 sps:$4 sm:$0xff]   ;;  %p3958_p1 = scmp.ne.s32.totalorder %s2721_s16, %s3957_s22  ;;  %p4613_p4 = scmp.ne.s32.totalorder %s4592_s21, 0 }
  0xfb   : > { %s4062_s0 = smov [#allocation19]  }
  0xfc   : > { %1267 = vmatpush1.bf16.msra.mxu0 %v3397_v47  ;;  %v3496_v47 = vld [vmem:[#allocation13 + $0xc0] ss:$8 sps:$4 sm:$0xff]   ;;  %p3959_p6 = pnand %p3958_p1, %p4613_p4  ;;  %s3961_s11 = sshll.u32 %s4062_s0, 4  ;;  %s3962_s11 = int_to_ptr.vmem [resolvable:$false] %s3961_s11 }
  0xfd   : > { %1024 = vmatpush1.bf16.msra.mxu1 %v3360_v21  ;;  %1268 = vmatprep.subr.bf16.mxu0 %v3402_v48  ;;  %v3432_v21 = vld [vmem:[#allocation10 + $0x84] ss:$8 sps:$4 sm:$0xff]   ;;  %v3504_v48 = vld [vmem:[#allocation13 + $0xb4] ss:$8 sps:$4 sm:$0xff]   ;;  %s3963_s8 = scalar_lea.vmem %s3962_s11, 256  ;;  %p3964_p3 = scmp.lt.s32.totalorder %s2721_s16, %s3962_s11 }
  0xfe   : > { %1025 = vmatprep.subr.bf16.mxu1 %v3361_v22  ;;  %v3430_v22 = vld [vmem:[#allocation10 + $0x80] ss:$8 sps:$4 sm:$0xff]   ;;  %s4501_s4 = scalar_lea.hbm %s4612_s1, %s3168_s23  ;;  %p3960_p11 = pneg %p3959_p6 }
  0xff   : > { %p3965_p7 = scmp.lt.s32.totalorder %s3963_s8, %s3957_s22 }
 0x100   : > { %1269 = vmatpush1.bf16.msra.mxu0 %v3400_v49  ;;  %v3502_v49 = vld [vmem:[#allocation13 + $0xb0] ss:$8 sps:$4 sm:$0xff]  }
 0x101   : > { %1026 = vmatpush2.bf16.msra.mxu1 %v3363_v23  ;;  %1270 = vmatprep.subr.bf16.mxu0 %v3405_v50  ;;  %v3433_v23 = vld [vmem:[#allocation13 + $0x70] ss:$8 sps:$4 sm:$0xff]   ;;  %v3510_v50 = vld [vmem:[#allocation13 + $0xa4] ss:$8 sps:$4 sm:$0xff]   ;;  %p3966_p8 = por %p3965_p7, %p3964_p3 }
 0x102   : > { %1027 = vmatprep.subr.bf16.mxu1 %v3364_v24  ;;  %v3435_v24 = vld [vmem:[#allocation13 + $0x74] ss:$8 sps:$4 sm:$0xff]  }
 0x103   : > { %p3967_p10 = pnand %p3966_p8, %p3960_p11 }
 0x104   : > { %1271 = vmatpush1.bf16.msra.mxu0 %v3403_v51  ;;  %v3508_v51 = vld [vmem:[#allocation13 + $0xa0] ss:$8 sps:$4 sm:$0xff]  }
 0x105   : > { %1028 = vmatpush2.bf16.msra.mxu1 %v3366_v25  ;;  %1272 = vmatprep.subr.bf16.mxu0 %v3408_v52  ;;  %v3438_v25 = vld [vmem:[#allocation13 + $0x64] ss:$8 sps:$4 sm:$0xff]   ;;  %v3516_v52 = vld [vmem:[#allocation13 + $0x94] ss:$8 sps:$4 sm:$0xff]  }
 0x106   : > { %1029 = vmatprep.subr.bf16.mxu1 %v3367_v26  ;;  %v3441_v26 = vld [vmem:[#allocation13 + $0x174] ss:$8 sps:$4 sm:$0xff]  }
 0x108   : > { %1273 = vmatpush1.bf16.msra.mxu0 %v3406_v53  ;;  %v3514_v53 = vld [vmem:[#allocation13 + $0x90] ss:$8 sps:$4 sm:$0xff]  }
 0x109   : > { %1030 = vmatpush2.bf16.msra.mxu1 %v3369_v27  ;;  %1274 = vmatprep.subr.bf16.mxu0 %v3411_v54  ;;  %v3436_v27 = vld [vmem:[#allocation13 + $0x60] ss:$8 sps:$4 sm:$0xff]   ;;  %v3522_v54 = vld [vmem:[#allocation13 + $0x84] ss:$8 sps:$4 sm:$0xff]  }
 0x10a   : > { %1031 = vmatprep.subr.bf16.mxu1 %v3370_v28  ;;  %v3444_v28 = vld [vmem:[#allocation13 + $0x54] ss:$8 sps:$4 sm:$0xff]  }
 0x10c   : > { %1275 = vmatpush2.bf16.msra.mxu0 %v3409_v55  ;;  %v1333_v55 = vld [vmem:[%s4412_s6] sm:$0xff] }
 0x10d   : > { %1032 = vmatpush2.bf16.msra.mxu1 %v3372_v29  ;;  %1276 = vmatprep.subr.bf16.mxu0 %v3414_v56  ;;  %v3442_v29 = vld [vmem:[#allocation13 + $0x50] ss:$8 sps:$4 sm:$0xff]   ;;  %v2987_v56 = vcombine.high %v1333_v55, %v1333_v55 }
 0x10e   : > { %1033 = vmatprep.subr.bf16.mxu1 %v3373_v30  ;;  %v3450_v30 = vld [vmem:[#allocation13 + $0x44] ss:$8 sps:$4 sm:$0xff]  }
 0x110   : > { %1277 = vmatpush2.bf16.msra.mxu0 %v3412_v57  ;;  %v3520_v57 = vld [vmem:[#allocation13 + $0x80] ss:$8 sps:$4 sm:$0xff]  }
 0x111   : > { %1034 = vmatpush2.bf16.msra.mxu1 %v3375_v31  ;;  %1278 = vmatprep.subr.bf16.mxu0 %v3417_v58  ;;  %v3448_v31 = vld [vmem:[#allocation13 + $0x40] ss:$8 sps:$4 sm:$0xff]   ;;  %v2986_v58 = vcombine.low %v1333_v55, %v1333_v55  ;;  %v3489_v55 = vld [vmem:[#allocation13 + $0x1f4] ss:$8 sps:$4 sm:$0xff]  }
 0x112   : > { %1035 = vmatprep.subr.bf16.mxu1 %v3376_v32  ;;  %v3456_v32 = vld [vmem:[#allocation13 + $0x34] ss:$8 sps:$4 sm:$0xff]  }
 0x114   : > { %1279 = vmatpush2.bf16.msra.mxu0 %v3415_v59  ;;  %v3533_v59 = vld [vmem:[#allocation11 + $0x70] ss:$8 sps:$4 sm:$0xff]  }
 0x115   : > { %1036 = vmatpush2.bf16.msra.mxu1 %v3378_v33  ;;  %1280 = vmatprep.subr.bf16.mxu0 %v3420_v60  ;;  %v3454_v33 = vld [vmem:[#allocation13 + $0x30] ss:$8 sps:$4 sm:$0xff]   ;;  %v3535_v60 = vld [vmem:[#allocation11 + $0x74] ss:$8 sps:$4 sm:$0xff]  }
 0x116   : > { %1037 = vmatprep.subr.bf16.mxu1 %v3379_v34  ;;  %v3462_v34 = vld [vmem:[#allocation13 + $0x24] ss:$8 sps:$4 sm:$0xff]  }
 0x118   : > { %1281 = vmatpush2.bf16.msra.mxu0 %v3418_v61  ;;  %v3538_v61 = vld [vmem:[#allocation11 + $0x64] ss:$8 sps:$4 sm:$0xff]  }
 0x119   : > { %1038 = vmatpush2.bf16.msra.mxu1 %v3381_v35  ;;  %1282 = vmatprep.subr.bf16.mxu0 %v3423_v62  ;;  %v3460_v35 = vld [vmem:[#allocation13 + $0x20] ss:$8 sps:$4 sm:$0xff]  }
 0x11a   : > { %1039 = vmatprep.subr.bf16.mxu1 %v3382_v36  ;;  %v3468_v36 = vld [vmem:[#allocation13 + $0x14] ss:$8 sps:$4 sm:$0xff]   ;;  %v3536_v62 = vld [vmem:[#allocation11 + $0x60] ss:$8 sps:$4 sm:$0xff]  }
 0x11c   : > { %1283 = vmatpush2.bf16.msra.mxu0 %v3421_v63  ;;  %v3541_v63 = vld [vmem:[#allocation11 + $0x54] ss:$8 sps:$4 sm:$0xff]  }
 0x11d   : > { %1040 = vmatpush2.bf16.msra.mxu1 %v3384_v37  ;;  %1284 = vmatprep.subr.bf16.mxu0 %v3426_v0  ;;  %v3466_v37 = vld [vmem:[#allocation13 + $0x10] ss:$8 sps:$4 sm:$0xff]  }
 0x11e   : > { %1733 = vmatprep.subr.bf16.mxu1 %v3435_v24  ;;  %v3539_v0 = vld [vmem:[#allocation11 + $0x50] ss:$8 sps:$4 sm:$0xff]   ;;  %v3574_v24 = vld [vmem:[#allocation11 + $0xa4] ss:$8 sps:$4 sm:$0xff]  }
 0x120   : > { %1285 = vmatpush2.bf16.msra.mxu0 %v3424_v1  ;;  %v3544_v1 = vld [vmem:[#allocation11 + $0x44] ss:$8 sps:$4 sm:$0xff]  }
 0x121   : > { %1286 = vmatprep.subr.bf16.mxu0 %v3429_v19  ;;  %v3568_v19 = vld [vmem:[#allocation11 + $0xc4] ss:$8 sps:$4 sm:$0xff]  }
 0x124   : > { %1287 = vmatpush2.bf16.msra.mxu0 %v3427_v20  ;;  %v3566_v20 = vld [vmem:[#allocation11 + $0xc0] ss:$8 sps:$4 sm:$0xff]  }
 0x125   : > { %1288 = vmatprep.subr.bf16.mxu0 %v3432_v21  ;;  %v3571_v21 = vld [vmem:[#allocation11 + $0xb4] ss:$8 sps:$4 sm:$0xff]  }
 0x128   : > { %1289 = vmatpush2.bf16.msra.mxu0 %v3430_v22  ;;  %v3569_v22 = vld [vmem:[#allocation11 + $0xb0] ss:$8 sps:$4 sm:$0xff]  }
 0x129   : > { %1774 = vmatprep.subr.bf16.mxu0 %v3441_v26  ;;  %v3572_v26 = vld [vmem:[#allocation11 + $0xa0] ss:$8 sps:$4 sm:$0xff]  }
 0x1a6   : > { %v794_v9 = vpop.f32.mrf.mxu0 }
 0x1a7   : > { %v795_v10 = vadd.f32 %v794_v9, %v729_v7  ;;  %v3550_v7 = vld [vmem:[#allocation11 + $0x24] ss:$8 sps:$4 sm:$0xff]   ;;  %v3553_v9 = vld [vmem:[#allocation11 + $0x14] ss:$8 sps:$4 sm:$0xff]  }
 0x1a8   : > { %v796_v11 = vpop.f32.mrf.mxu0 }
 0x1a9   : > { %v797_v12 = vadd.f32 %v796_v11, %v733_v8  ;;  %v801_v13 = vmax.f32 %v795_v10, 0.0  ;;  %v3548_v8 = vld [vmem:[#allocation11 + $0x20] ss:$8 sps:$4 sm:$0xff]   ;;  %v3551_v10 = vld [vmem:[#allocation11 + $0x10] ss:$8 sps:$4 sm:$0xff]  }
 0x1aa   : > { %v798_v14 = vpop.f32.mrf.mxu0  ;;  %v3556_v11 = vld [vmem:[#allocation11 + $0x4] ss:$8 sps:$4 sm:$0xff]  }
 0x1ab   : > { %v802_v15 = vmax.f32 %v797_v12, 0.0  ;;  %v803_v18 = vpack.c.bf16 %v801_v13, %v801_v13  ;;  %v3554_v12 = vld [vmem:[#allocation11] ss:$8 sps:$4 sm:$0xff]   ;;  %v3559_v13 = vld [vmem:[#allocation11 + $0xf4] ss:$8 sps:$4 sm:$0xff]  }
 0x1ac   : > { %v799_v16 = vpop.f32.mrf.mxu0  ;;  %v3557_v14 = vld [vmem:[#allocation11 + $0xf0] ss:$8 sps:$4 sm:$0xff]  }
 0x1ad   : > { %v804_v17 = vpack.c.bf16 %v802_v15, %v802_v15  ;;  %v3562_v15 = vld [vmem:[#allocation11 + $0xe4] ss:$8 sps:$4 sm:$0xff]   ;;  %v3560_v16 = vld [vmem:[#allocation11 + $0xe0] ss:$8 sps:$4 sm:$0xff]  }
 0x1af   : > { %1041 = vmatprep.mubr.bf16.mxu1 %v804_v17  ;;  %v3565_v17 = vld [vmem:[#allocation11 + $0xd4] ss:$8 sps:$4 sm:$0xff]  }
 0x1b0   : > { %1042 = vmatmul.mubr.bf16.vlgmr.msra.gmra.mxu1 %v803_v18  ;;  %v3563_v18 = vld [vmem:[#allocation11 + $0xd0] ss:$8 sps:$4 sm:$0xff]  }
 0x1b1   : > { %1734 = vmatpush1.bf16.msra.mxu1 %v3433_v23  ;;  %1765 = vmatprep.mubr.bf16.mxu1 %v2987_v56  ;;  %v837_v23 = vld [vmem:[%s4543_s5] sm:$0x3] }
 0x1b2   : > { %1735 = vmatprep.subr.bf16.mxu1 %v3438_v25  ;;  %v842_v25 = vrot.slane %v837_v23, %v4439_v4  ;;  %v3487_v56 = vld [vmem:[#allocation13 + $0x1f0] ss:$8 sps:$4 sm:$0xff]  }
 0x1b5   : > { %1736 = vmatpush1.bf16.msra.mxu1 %v3436_v27  ;;  %v846_v27 = vrot.slane %v837_v23, %v4444_v6  ;;  %v3587_v23 = vld [vmem:[#allocation14 + $0x50] ss:$8 sps:$4 sm:$0xff]  }
 0x1b6   : > { %1737 = vmatprep.subr.bf16.mxu1 %v3444_v28 }
 0x1b9   : > { %1738 = vmatpush1.bf16.msra.mxu1 %v3442_v29 }
 0x1ba   : > { %1739 = vmatprep.subr.bf16.mxu1 %v3450_v30 }
 0x1bd   : > { %1740 = vmatpush1.bf16.msra.mxu1 %v3448_v31 }
 0x1be   : > { %1741 = vmatprep.subr.bf16.mxu1 %v3456_v32 }
 0x1c1   : > { %1742 = vmatpush1.bf16.msra.mxu1 %v3454_v33 }
 0x1c2   : > { %1743 = vmatprep.subr.bf16.mxu1 %v3462_v34  ;;  %v4455_v34 = vld [vmem:[%s4412_s6 + $0x8] sm:$0xff]  ;;  %s4611_s6 = sld [smem:[#allocation40_spill]] }
 0x1c5   : > { %1744 = vmatpush1.bf16.msra.mxu1 %v3460_v35 }
 0x1c6   : > { %1745 = vmatprep.subr.bf16.mxu1 %v3468_v36 }
 0x1c9   : > { %1746 = vmatpush1.bf16.msra.mxu1 %v3466_v37 }
 0x1ca   : > { %1747 = vmatprep.subr.bf16.mxu1 %v3474_v38  ;;  %v3439_v38 = vld [vmem:[#allocation13 + $0x170] ss:$8 sps:$4 sm:$0xff]  }
 0x1cd   : > { %1748 = vmatpush1.bf16.msra.mxu1 %v3472_v39  ;;  %v2989_v39 = vcombine.high %v4455_v34, %v4455_v34 }
 0x1ce   : > { %1749 = vmatprep.subr.bf16.mxu1 %v3480_v40 }
 0x1d1   : > { %1750 = vmatpush2.bf16.msra.mxu1 %v3478_v41  ;;  %v3447_v41 = vld [vmem:[#allocation13 + $0x164] ss:$8 sps:$4 sm:$0xff]  }
 0x1d2   : > { %1751 = vmatprep.subr.bf16.mxu1 %v3486_v42  ;;  %v3445_v42 = vld [vmem:[#allocation13 + $0x160] ss:$8 sps:$4 sm:$0xff]  }
 0x1d5   : > { %1752 = vmatpush2.bf16.msra.mxu1 %v3484_v43  ;;  %v3453_v43 = vld [vmem:[#allocation13 + $0x154] ss:$8 sps:$4 sm:$0xff]  }
 0x1d6   : > { %1753 = vmatprep.subr.bf16.mxu1 %v3492_v44  ;;  %v3451_v44 = vld [vmem:[#allocation13 + $0x150] ss:$8 sps:$4 sm:$0xff]  }
 0x1d9   : > { %1754 = vmatpush2.bf16.msra.mxu1 %v3490_v45  ;;  %v3459_v45 = vld [vmem:[#allocation13 + $0x144] ss:$8 sps:$4 sm:$0xff]  }
 0x1da   : > { %1755 = vmatprep.subr.bf16.mxu1 %v3498_v46  ;;  %v3457_v46 = vld [vmem:[#allocation13 + $0x140] ss:$8 sps:$4 sm:$0xff]  }
 0x1dd   : > { %1756 = vmatpush2.bf16.msra.mxu1 %v3496_v47  ;;  %v3465_v47 = vld [vmem:[#allocation13 + $0x134] ss:$8 sps:$4 sm:$0xff]  }
 0x1de   : > { %1757 = vmatprep.subr.bf16.mxu1 %v3504_v48  ;;  %v3463_v48 = vld [vmem:[#allocation13 + $0x130] ss:$8 sps:$4 sm:$0xff]  }
 0x1e1   : > { %1758 = vmatpush2.bf16.msra.mxu1 %v3502_v49  ;;  %v3471_v49 = vld [vmem:[#allocation13 + $0x124] ss:$8 sps:$4 sm:$0xff]  }
 0x1e2   : > { %1759 = vmatprep.subr.bf16.mxu1 %v3510_v50  ;;  %v3469_v50 = vld [vmem:[#allocation13 + $0x120] ss:$8 sps:$4 sm:$0xff]  }
 0x1e5   : > { %1760 = vmatpush2.bf16.msra.mxu1 %v3508_v51  ;;  %v3477_v51 = vld [vmem:[#allocation13 + $0x114] ss:$8 sps:$4 sm:$0xff]  }
 0x1e6   : > { %1761 = vmatprep.subr.bf16.mxu1 %v3516_v52  ;;  %v3475_v52 = vld [vmem:[#allocation13 + $0x110] ss:$8 sps:$4 sm:$0xff]  }
 0x1e9   : > { %1762 = vmatpush2.bf16.msra.mxu1 %v3514_v53  ;;  %v3483_v53 = vld [vmem:[#allocation13 + $0x104] ss:$8 sps:$4 sm:$0xff]  }
 0x1ea   : > { %1763 = vmatprep.subr.bf16.mxu1 %v3522_v54  ;;  %v3481_v54 = vld [vmem:[#allocation13 + $0x100] ss:$8 sps:$4 sm:$0xff]  }
 0x1ed   : > { %1764 = vmatpush2.bf16.msra.mxu1 %v3520_v57  ;;  %v3495_v57 = vld [vmem:[#allocation13 + $0x1e4] ss:$8 sps:$4 sm:$0xff]  }
 0x1ee   : > { %1975 = vmatprep.subr.bf16.mxu1 %v3535_v60  ;;  %v3499_v60 = vld [vmem:[#allocation13 + $0x1d0] ss:$8 sps:$4 sm:$0xff]  }
 0x1f0   : > { %1766 = vmatmul.mubr.bf16.vlgmr.msra.gmra.mxu1 %v2986_v58  ;;  %v3493_v58 = vld [vmem:[#allocation13 + $0x1e0] ss:$8 sps:$4 sm:$0xff]  }
 0x1f1   : > { %1976 = vmatpush1.bf16.msra.mxu1 %v3533_v59  ;;  %v3501_v59 = vld [vmem:[#allocation13 + $0x1d4] ss:$8 sps:$4 sm:$0xff]  }
 0x1f2   : > { %1977 = vmatprep.subr.bf16.mxu1 %v3538_v61  ;;  %v3507_v61 = vld [vmem:[#allocation13 + $0x1c4] ss:$8 sps:$4 sm:$0xff]  }
 0x1f5   : > { %1978 = vmatpush1.bf16.msra.mxu1 %v3536_v62  ;;  %v3505_v62 = vld [vmem:[#allocation13 + $0x1c0] ss:$8 sps:$4 sm:$0xff]  }
 0x1f6   : > { %1979 = vmatprep.subr.bf16.mxu1 %v3541_v63  ;;  %v3513_v63 = vld [vmem:[#allocation13 + $0x1b4] ss:$8 sps:$4 sm:$0xff]  }
 0x1f9   : > { %1980 = vmatpush1.bf16.msra.mxu1 %v3539_v0  ;;  %v3511_v0 = vld [vmem:[#allocation13 + $0x1b0] ss:$8 sps:$4 sm:$0xff]  }
 0x1fa   : > { %1981 = vmatprep.subr.bf16.mxu1 %v3544_v1  ;;  %v3519_v1 = vld [vmem:[#allocation13 + $0x1a4] ss:$8 sps:$4 sm:$0xff]  }
 0x1fd   : > { %1982 = vmatpush1.bf16.msra.mxu1 %v3542_v2  ;;  %v3517_v2 = vld [vmem:[#allocation13 + $0x1a0] ss:$8 sps:$4 sm:$0xff]  }
 0x1fe   : > { %1983 = vmatprep.subr.bf16.mxu1 %v3547_v3  ;;  %v3525_v3 = vld [vmem:[#allocation13 + $0x194] ss:$8 sps:$4 sm:$0xff]  }
 0x201   : > { %1984 = vmatpush1.bf16.msra.mxu1 %v3545_v5  ;;  %v3523_v5 = vld [vmem:[#allocation13 + $0x190] ss:$8 sps:$4 sm:$0xff]  }
 0x202   : > { %1985 = vmatprep.subr.bf16.mxu1 %v3550_v7  ;;  %v3530_v7 = vld [vmem:[#allocation13 + $0x184] ss:$8 sps:$4 sm:$0xff]  }
 0x205   : > { %1986 = vmatpush1.bf16.msra.mxu1 %v3548_v8  ;;  %v3528_v8 = vld [vmem:[#allocation13 + $0x180] ss:$8 sps:$4 sm:$0xff]  }
 0x206   : > { %1987 = vmatprep.subr.bf16.mxu1 %v3553_v9  ;;  %v2988_v9 = vcombine.low %v4455_v34, %v4455_v34  ;;  %v3607_v34 = vld [vmem:[#allocation14 + $0xf4] ss:$8 sps:$4 sm:$0xff]  }
 0x209   : > { %1988 = vmatpush1.bf16.msra.mxu1 %v3551_v10  ;;  %v3577_v10 = vld [vmem:[#allocation11 + $0x94] ss:$8 sps:$4 sm:$0xff]  }
 0x20a   : > { %1989 = vmatprep.subr.bf16.mxu1 %v3556_v11  ;;  %v3575_v11 = vld [vmem:[#allocation11 + $0x90] ss:$8 sps:$4 sm:$0xff]  }
 0x20d   : > { %1990 = vmatpush1.bf16.msra.mxu1 %v3554_v12  ;;  %v3580_v12 = vld [vmem:[#allocation11 + $0x84] ss:$8 sps:$4 sm:$0xff]  }
 0x20e   : > { %1991 = vmatprep.subr.bf16.mxu1 %v3559_v13  ;;  %v3578_v13 = vld [vmem:[#allocation11 + $0x80] ss:$8 sps:$4 sm:$0xff]  }
 0x211   : > { %1992 = vmatpush2.bf16.msra.mxu1 %v3557_v14 }
 0x212   : > { %1993 = vmatprep.subr.bf16.mxu1 %v3562_v15  ;;  %v3581_v15 = vld [vmem:[#allocation14 + $0x70] ss:$8 sps:$4 sm:$0xff]  }
 0x215   : > { %1994 = vmatpush2.bf16.msra.mxu1 %v3560_v16  ;;  %v3583_v16 = vld [vmem:[#allocation14 + $0x74] ss:$8 sps:$4 sm:$0xff]  }
 0x216   : > { %1995 = vmatprep.subr.bf16.mxu1 %v3565_v17 }
 0x219   : > { %1996 = vmatpush2.bf16.msra.mxu1 %v3563_v18  ;;  %v3586_v18 = vld [vmem:[#allocation14 + $0x64] ss:$8 sps:$4 sm:$0xff]  }
 0x21a   : > { %1997 = vmatprep.subr.bf16.mxu1 %v3568_v19 }
 0x21d   : > { %1998 = vmatpush2.bf16.msra.mxu1 %v3566_v20  ;;  %v3584_v20 = vld [vmem:[#allocation14 + $0x60] ss:$8 sps:$4 sm:$0xff]  }
 0x21e   : > { %1999 = vmatprep.subr.bf16.mxu1 %v3571_v21  ;;  %v3589_v21 = vld [vmem:[#allocation14 + $0x54] ss:$8 sps:$4 sm:$0xff]  }
 0x221   : > { %2000 = vmatpush2.bf16.msra.mxu1 %v3569_v22 }
 0x222   : > { %2001 = vmatprep.subr.bf16.mxu1 %v3574_v24  ;;  %v3592_v24 = vld [vmem:[#allocation14 + $0x44] ss:$8 sps:$4 sm:$0xff]  }
 0x225   : > { %2002 = vmatpush2.bf16.msra.mxu1 %v3572_v26  ;;  %v3595_v26 = vld [vmem:[#allocation14 + $0x34] ss:$8 sps:$4 sm:$0xff]  }
 0x226   : > { %2003 = vmatprep.subr.bf16.mxu1 %v3577_v10  ;;  %v3638_v10 = vld [vmem:[#allocation16 + $0x40] ss:$8 sps:$4 sm:$0xff]  }
 0x229   : > { %2004 = vmatpush2.bf16.msra.mxu1 %v3575_v11  ;;  %v3643_v11 = vld [vmem:[#allocation16 + $0x34] ss:$8 sps:$4 sm:$0xff]  }
 0x22a   : > { %2005 = vmatprep.subr.bf16.mxu1 %v3580_v12  ;;  %v3641_v12 = vld [vmem:[#allocation16 + $0x30] ss:$8 sps:$4 sm:$0xff]  }
 0x22d   : > { %2006 = vmatpush2.bf16.msra.mxu1 %v3578_v13  ;;  %v3646_v13 = vld [vmem:[#allocation16 + $0x24] ss:$8 sps:$4 sm:$0xff]  }
 0x270   : > { %v1043_v28 = vpop.f32.mrf.mxu1 }
 0x271   : > { %v1044_v29 = vadd.f32 %v1043_v28, %v842_v25  ;;  %v3590_v25 = vld [vmem:[#allocation14 + $0x40] ss:$8 sps:$4 sm:$0xff]   ;;  %v3598_v28 = vld [vmem:[#allocation14 + $0x24] ss:$8 sps:$4 sm:$0xff]  }
 0x272   : > { %v1045_v30 = vpop.f32.mrf.mxu1 }
 0x273   : > { %v1046_v31 = vadd.f32 %v1045_v30, %v846_v27  ;;  %v1050_v32 = vmax.f32 %v1044_v29, 0.0  ;;  %v3593_v27 = vld [vmem:[#allocation14 + $0x30] ss:$8 sps:$4 sm:$0xff]   ;;  %v3596_v29 = vld [vmem:[#allocation14 + $0x20] ss:$8 sps:$4 sm:$0xff]  }
 0x274   : > { %v1047_v33 = vpop.f32.mrf.mxu1  ;;  %v3601_v30 = vld [vmem:[#allocation14 + $0x14] ss:$8 sps:$4 sm:$0xff]  }
 0x275   : > { %v1051_v35 = vmax.f32 %v1046_v31, 0.0  ;;  %v1052_v40 = vpack.c.bf16 %v1050_v32, %v1050_v32  ;;  %v3599_v31 = vld [vmem:[#allocation14 + $0x10] ss:$8 sps:$4 sm:$0xff]   ;;  %v3604_v32 = vld [vmem:[#allocation14 + $0x4] ss:$8 sps:$4 sm:$0xff]  }
 0x276   : > { %v1048_v36 = vpop.f32.mrf.mxu1  ;;  %v3602_v33 = vld [vmem:[#allocation14] ss:$8 sps:$4 sm:$0xff]  }
 0x277   : > { %v1053_v37 = vpack.c.bf16 %v1051_v35, %v1051_v35  ;;  %v3605_v35 = vld [vmem:[#allocation14 + $0xf0] ss:$8 sps:$4 sm:$0xff]   ;;  %v3610_v36 = vld [vmem:[#allocation14 + $0xe4] ss:$8 sps:$4 sm:$0xff]  }
 0x279   : > { %1290 = vmatprep.mubr.bf16.mxu0 %v1053_v37  ;;  %v3608_v37 = vld [vmem:[#allocation14 + $0xe0] ss:$8 sps:$4 sm:$0xff]  }
 0x27a   : > { %1291 = vmatmul.mubr.bf16.vlgmr.msra.gmra.mxu0 %v1052_v40  ;;  %v3616_v40 = vld [vmem:[#allocation14 + $0xc4] ss:$8 sps:$4 sm:$0xff]  }
 0x27b   : > { %1775 = vmatpush1.bf16.msra.mxu0 %v3439_v38  ;;  %1806 = vmatprep.mubr.bf16.mxu0 %v2989_v39  ;;  %v3613_v38 = vld [vmem:[#allocation14 + $0xd4] ss:$8 sps:$4 sm:$0xff]   ;;  %v3611_v39 = vld [vmem:[#allocation14 + $0xd0] ss:$8 sps:$4 sm:$0xff]  }
 0x27c   : > { %1776 = vmatprep.subr.bf16.mxu0 %v3447_v41  ;;  %v3614_v41 = vld [vmem:[#allocation14 + $0xc0] ss:$8 sps:$4 sm:$0xff]  }
 0x27f   : > { %1777 = vmatpush1.bf16.msra.mxu0 %v3445_v42  ;;  %v3619_v42 = vld [vmem:[#allocation14 + $0xb4] ss:$8 sps:$4 sm:$0xff]  }
 0x280   : > { %1778 = vmatprep.subr.bf16.mxu0 %v3453_v43  ;;  %v3617_v43 = vld [vmem:[#allocation14 + $0xb0] ss:$8 sps:$4 sm:$0xff]  }
 0x283   : > { %1779 = vmatpush1.bf16.msra.mxu0 %v3451_v44  ;;  %v1086_v44 = vld [vmem:[%s4545_s7] sm:$0x3] }
 0x284   : > { %1780 = vmatprep.subr.bf16.mxu0 %v3459_v45  ;;  %v1091_v45 = vrot.slane %v1086_v44, %v4439_v4 }
 0x287   : > { %1781 = vmatpush1.bf16.msra.mxu0 %v3457_v46  ;;  %v1095_v46 = vrot.slane %v1086_v44, %v4444_v6 }
 0x288   : > { %1782 = vmatprep.subr.bf16.mxu0 %v3465_v47 }
 0x28b   : > { %1783 = vmatpush1.bf16.msra.mxu0 %v3463_v48 }
 0x28c   : > { %1784 = vmatprep.subr.bf16.mxu0 %v3471_v49 }
 0x28f   : > { %1785 = vmatpush1.bf16.msra.mxu0 %v3469_v50 }
 0x290   : > { %1786 = vmatprep.subr.bf16.mxu0 %v3477_v51 }
 0x293   : > { %1787 = vmatpush1.bf16.msra.mxu0 %v3475_v52 }
 0x294   : > { %1788 = vmatprep.subr.bf16.mxu0 %v3483_v53 }
 0x297   : > { %1789 = vmatpush1.bf16.msra.mxu0 %v3481_v54 }
 0x298   : > { %1790 = vmatprep.subr.bf16.mxu0 %v3489_v55 }
 0x29b   : > { %1791 = vmatpush2.bf16.msra.mxu0 %v3487_v56 }
 0x29c   : > { %1792 = vmatprep.subr.bf16.mxu0 %v3495_v57 }
 0x29f   : > { %1793 = vmatpush2.bf16.msra.mxu0 %v3493_v58 }
 0x2a0   : > { %1794 = vmatprep.subr.bf16.mxu0 %v3501_v59  ;;  %v3622_v59 = vld [vmem:[#allocation14 + $0xa4] ss:$8 sps:$4 sm:$0xff]  }
 0x2a3   : > { %1795 = vmatpush2.bf16.msra.mxu0 %v3499_v60  ;;  %v3620_v60 = vld [vmem:[#allocation14 + $0xa0] ss:$8 sps:$4 sm:$0xff]  }
 0x2a4   : > { %1796 = vmatprep.subr.bf16.mxu0 %v3507_v61  ;;  %v3625_v61 = vld [vmem:[#allocation14 + $0x94] ss:$8 sps:$4 sm:$0xff]  }
 0x2a7   : > { %1797 = vmatpush2.bf16.msra.mxu0 %v3505_v62  ;;  %v3623_v62 = vld [vmem:[#allocation14 + $0x90] ss:$8 sps:$4 sm:$0xff]  }
 0x2a8   : > { %1798 = vmatprep.subr.bf16.mxu0 %v3513_v63  ;;  %v3628_v63 = vld [vmem:[#allocation14 + $0x84] ss:$8 sps:$4 sm:$0xff]  }
 0x2ab   : > { %1799 = vmatpush2.bf16.msra.mxu0 %v3511_v0  ;;  %v3626_v0 = vld [vmem:[#allocation14 + $0x80] ss:$8 sps:$4 sm:$0xff]  }
 0x2ac   : > { %1800 = vmatprep.subr.bf16.mxu0 %v3519_v1  ;;  %v3629_v1 = vld [vmem:[#allocation16 + $0x70] ss:$8 sps:$4 sm:$0xff]  }
 0x2af   : > { %1801 = vmatpush2.bf16.msra.mxu0 %v3517_v2  ;;  %v3631_v2 = vld [vmem:[#allocation16 + $0x74] ss:$8 sps:$4 sm:$0xff]  }
 0x2b0   : > { %1802 = vmatprep.subr.bf16.mxu0 %v3525_v3  ;;  %v4461_v14 = vpop.f32.mrf.mxu1  ;;  %v3634_v3 = vld [vmem:[#allocation16 + $0x64] ss:$8 sps:$4 sm:$0xff]   ;;  %2487 = vmatprep.subr.bf16.mxu1 %v3631_v2 }
 0x2b2   : > { %v4463_v17 = vpop.f32.mrf.mxu1 }
 0x2b3   : > { %1803 = vmatpush2.bf16.msra.mxu0 %v3523_v5  ;;  %v3632_v5 = vld [vmem:[#allocation16 + $0x60] ss:$8 sps:$4 sm:$0xff]  }
 0x2b4   : > { %1804 = vmatprep.subr.bf16.mxu0 %v3530_v7  ;;  %v1771_v19 = vpop.f32.mrf.mxu1  ;;  %v3637_v7 = vld [vmem:[#allocation16 + $0x54] ss:$8 sps:$4 sm:$0xff]  }
 0x2b5   : > { %v3652_v19 = vld [vmem:[#allocation16 + $0x4] ss:$8 sps:$4 sm:$0xff]  }
 0x2b6   : > { %v1772_v22 = vpop.f32.mrf.mxu1 }
 0x2b7   : > { %1805 = vmatpush2.bf16.msra.mxu0 %v3528_v8  ;;  %v3635_v8 = vld [vmem:[#allocation16 + $0x50] ss:$8 sps:$4 sm:$0xff]  }
 0x2b8   : > { %2238 = vmatprep.subr.bf16.mxu0 %v3583_v16  ;;  %v3649_v16 = vld [vmem:[#allocation16 + $0x14] ss:$8 sps:$4 sm:$0xff]   ;;  %v3653_v22 = vld [vmem:[#allocation16 + $0xf0] ss:$8 sps:$4 sm:$0xff]  }
 0x2ba   : > { %1807 = vmatmul.mubr.bf16.vlgmr.msra.gmra.mxu0 %v2988_v9  ;;  %v3640_v9 = vld [vmem:[#allocation16 + $0x44] ss:$8 sps:$4 sm:$0xff]  }
 0x2bb   : > { %2239 = vmatpush1.bf16.msra.mxu0 %v3581_v15  ;;  %v3644_v15 = vld [vmem:[#allocation16 + $0x20] ss:$8 sps:$4 sm:$0xff]  }
 0x2bc   : > { %2240 = vmatprep.subr.bf16.mxu0 %v3586_v18  ;;  %v3647_v18 = vld [vmem:[#allocation16 + $0x10] ss:$8 sps:$4 sm:$0xff]  }
 0x2bf   : > { %2241 = vmatpush1.bf16.msra.mxu0 %v3584_v20  ;;  %v3650_v20 = vld [vmem:[#allocation16] ss:$8 sps:$4 sm:$0xff]  }
 0x2c0   : > { %2242 = vmatprep.subr.bf16.mxu0 %v3589_v21  ;;  %v3655_v21 = vld [vmem:[#allocation16 + $0xf4] ss:$8 sps:$4 sm:$0xff]  }
 0x2c3   : > { %2243 = vmatpush1.bf16.msra.mxu0 %v3587_v23  ;;  %v3658_v23 = vld [vmem:[#allocation16 + $0xe4] ss:$8 sps:$4 sm:$0xff]  }
 0x2c4   : > { %2244 = vmatprep.subr.bf16.mxu0 %v3592_v24  ;;  %v3656_v24 = vld [vmem:[#allocation16 + $0xe0] ss:$8 sps:$4 sm:$0xff]  }
 0x2c7   : > { %2245 = vmatpush1.bf16.msra.mxu0 %v3590_v25  ;;  %v3661_v25 = vld [vmem:[#allocation16 + $0xd4] ss:$8 sps:$4 sm:$0xff]  }
 0x2c8   : > { %2246 = vmatprep.subr.bf16.mxu0 %v3595_v26  ;;  %v3659_v26 = vld [vmem:[#allocation16 + $0xd0] ss:$8 sps:$4 sm:$0xff]  }
 0x2cb   : > { %2247 = vmatpush1.bf16.msra.mxu0 %v3593_v27  ;;  %v3664_v27 = vld [vmem:[#allocation16 + $0xc4] ss:$8 sps:$4 sm:$0xff]  }
 0x2cc   : > { %2248 = vmatprep.subr.bf16.mxu0 %v3598_v28  ;;  %v3662_v28 = vld [vmem:[#allocation16 + $0xc0] ss:$8 sps:$4 sm:$0xff]  }
 0x2cf   : > { %2249 = vmatpush1.bf16.msra.mxu0 %v3596_v29  ;;  %v3667_v29 = vld [vmem:[#allocation16 + $0xb4] ss:$8 sps:$4 sm:$0xff]  }
 0x2d0   : > { %2250 = vmatprep.subr.bf16.mxu0 %v3601_v30  ;;  %v3665_v30 = vld [vmem:[#allocation16 + $0xb0] ss:$8 sps:$4 sm:$0xff]  }
 0x2d3   : > { %2251 = vmatpush1.bf16.msra.mxu0 %v3599_v31  ;;  %v3670_v31 = vld [vmem:[#allocation16 + $0xa4] ss:$8 sps:$4 sm:$0xff]  }
 0x2d4   : > { %2252 = vmatprep.subr.bf16.mxu0 %v3604_v32  ;;  %v3668_v32 = vld [vmem:[#allocation16 + $0xa0] ss:$8 sps:$4 sm:$0xff]  }
 0x2d7   : > { %2253 = vmatpush1.bf16.msra.mxu0 %v3602_v33  ;;  %v2016_v33 = vld [vmem:[%s4548_s10] sm:$0x3] }
 0x2d8   : > { %2254 = vmatprep.subr.bf16.mxu0 %v3607_v34 }
 0x2db   : > { %2255 = vmatpush2.bf16.msra.mxu0 %v3605_v35  ;;  %v2021_v35 = vrot.slane %v2016_v33, %v4439_v4 }
 0x2dc   : > { %2256 = vmatprep.subr.bf16.mxu0 %v3610_v36 }
 0x2df   : > { %2257 = vmatpush2.bf16.msra.mxu0 %v3608_v37 }
 0x2e0   : > { %2258 = vmatprep.subr.bf16.mxu0 %v3613_v38 }
 0x2e3   : > { %2259 = vmatpush2.bf16.msra.mxu0 %v3611_v39  ;;  %v2025_v39 = vrot.slane %v2016_v33, %v4444_v6 }
 0x2e4   : > { %2260 = vmatprep.subr.bf16.mxu0 %v3616_v40 }
 0x2e7   : > { %2261 = vmatpush2.bf16.msra.mxu0 %v3614_v41 }
 0x2e8   : > { %2262 = vmatprep.subr.bf16.mxu0 %v3619_v42 }
 0x2eb   : > { %2263 = vmatpush2.bf16.msra.mxu0 %v3617_v43 }
 0x2ec   : > { %2264 = vmatprep.subr.bf16.mxu0 %v3622_v59  ;;  %v3684_v59 = vld [vmem:[#allocation17 + $0x20] sm:$0xff]  }
 0x2ef   : > { %2265 = vmatpush2.bf16.msra.mxu0 %v3620_v60  ;;  %v3685_v60 = vld [vmem:[#allocation17 + $0x58] sm:$0xff]  }
 0x2f0   : > { %2266 = vmatprep.subr.bf16.mxu0 %v3625_v61  ;;  %v3686_v61 = vld [vmem:[#allocation17 + $0x18] sm:$0xff]  }
 0x2f3   : > { %2267 = vmatpush2.bf16.msra.mxu0 %v3623_v62  ;;  %v3687_v62 = vld [vmem:[#allocation17 + $0x50] sm:$0xff]  }
 0x2f4   : > { %2268 = vmatprep.subr.bf16.mxu0 %v3628_v63  ;;  %v3688_v63 = vld [vmem:[#allocation17 + $0x10] sm:$0xff]  }
 0x2f7   : > { %2269 = vmatpush2.bf16.msra.mxu0 %v3626_v0  ;;  %v2066_v0 = vld [vmem:[%s4550_s12] sm:$0x3] }
 0x2f8   : > { %v2075_v2 = vrot.slane %v2066_v0, %v4444_v6 }
 0x33a   : > { %v1292_v47 = vpop.f32.mrf.mxu0 }
 0x33b   : > { %v1293_v48 = vadd.f32 %v1292_v47, %v1091_v45 }
 0x33c   : > { %v1294_v49 = vpop.f32.mrf.mxu0 }
 0x33d   : > { %v1295_v50 = vadd.f32 %v1294_v49, %v1095_v46  ;;  %v1299_v53 = vpack.c.bf16 %v1293_v48, %v1293_v48 }
 0x33e   : > { %v1296_v51 = vpop.f32.mrf.mxu0 }
 0x33f   : > { %v1300_v52 = vpack.c.bf16 %v1295_v50, %v1295_v50  ;;  %v3671_v50 = vld [vmem:[#allocation16 + $0x90] ss:$8 sps:$4 sm:$0xff]   ;;  %v3674_v51 = vld [vmem:[#allocation16 + $0x80] ss:$8 sps:$4 sm:$0xff]  }
 0x340   : > { %v1297_v54 = vpop.f32.mrf.mxu0 }
 0x341   : > { %2007 = vmatprep.mubr.bf16.mxu1 %v1300_v52  ;;  %v3677_v52 = vld [vmem:[#allocation17 + $0x78] sm:$0xff]   ;;  %v3679_v54 = vld [vmem:[#allocation17 + $0x70] sm:$0xff]  }
 0x342   : > { %2008 = vmatmul.mubr.bf16.vlgmr.msra.gmra.mxu1 %v1299_v53  ;;  %v3678_v53 = vld [vmem:[#allocation17 + $0x38] sm:$0xff]   ;;  %3172 = vmatprep.subr.bf16.mxu0 %v3677_v52 }
 0x343   : > { %2488 = vmatpush1.bf16.msra.mxu1 %v3629_v1  ;;  %v2071_v1 = vrot.slane %v2066_v0, %v4439_v4 }
 0x344   : > { %2489 = vmatprep.subr.bf16.mxu1 %v3634_v3 }
 0x347   : > { %2490 = vmatpush1.bf16.msra.mxu1 %v3632_v5 }
 0x348   : > { %2491 = vmatprep.subr.bf16.mxu1 %v3637_v7 }
 0x34b   : > { %2492 = vmatpush1.bf16.msra.mxu1 %v3635_v8 }
 0x34c   : > { %2493 = vmatprep.subr.bf16.mxu1 %v3640_v9 }
 0x34f   : > { %2494 = vmatpush1.bf16.msra.mxu1 %v3638_v10 }
 0x350   : > { %2495 = vmatprep.subr.bf16.mxu1 %v3643_v11 }
 0x353   : > { %2496 = vmatpush1.bf16.msra.mxu1 %v3641_v12 }
 0x354   : > { %2497 = vmatprep.subr.bf16.mxu1 %v3646_v13 }
 0x357   : > { %2498 = vmatpush1.bf16.msra.mxu1 %v3644_v15 }
 0x358   : > { %2499 = vmatprep.subr.bf16.mxu1 %v3649_v16  ;;  %v3689_v16 = vld [vmem:[#allocation17 + $0x48] sm:$0xff]  }
 0x35b   : > { %2500 = vmatpush1.bf16.msra.mxu1 %v3647_v18  ;;  %v3690_v18 = vld [vmem:[#allocation17 + $0x8] sm:$0xff]  }
 0x35c   : > { %2501 = vmatprep.subr.bf16.mxu1 %v3652_v19  ;;  %v3691_v19 = vld [vmem:[#allocation17 + $0x40] sm:$0xff]  }
 0x35f   : > { %2502 = vmatpush1.bf16.msra.mxu1 %v3650_v20  ;;  %v3692_v20 = vld [vmem:[#allocation17] sm:$0xff]  }
 0x360   : > { %2503 = vmatprep.subr.bf16.mxu1 %v3655_v21  ;;  %v2315_v21 = vld [vmem:[%s4552_s14] sm:$0x3] }
 0x363   : > { %2504 = vmatpush2.bf16.msra.mxu1 %v3653_v22  ;;  %v2320_v22 = vrot.slane %v2315_v21, %v4439_v4  ;;  %v3150_v4 = vld [vmem:[%s4611_s6] ss:$0 sm:$0xff] }
 0x364   : > { %2505 = vmatprep.subr.bf16.mxu1 %v3658_v23  ;;  %v2324_v23 = vrot.slane %v2315_v21, %v4444_v6 }
 0x367   : > { %2506 = vmatpush2.bf16.msra.mxu1 %v3656_v24 }
 0x368   : > { %2507 = vmatprep.subr.bf16.mxu1 %v3661_v25 }
 0x36b   : > { %2508 = vmatpush2.bf16.msra.mxu1 %v3659_v26 }
 0x36c   : > { %2509 = vmatprep.subr.bf16.mxu1 %v3664_v27 }
 0x36f   : > { %2510 = vmatpush2.bf16.msra.mxu1 %v3662_v28 }
 0x370   : > { %2511 = vmatprep.subr.bf16.mxu1 %v3667_v29 }
 0x373   : > { %2512 = vmatpush2.bf16.msra.mxu1 %v3665_v30 }
 0x374   : > { %2513 = vmatprep.subr.bf16.mxu1 %v3670_v31 }
 0x377   : > { %2514 = vmatpush2.bf16.msra.mxu1 %v3668_v32 }
 0x37a   : > { %v4470_v55 = vpop.f32.mrf.mxu0 }
 0x37b   : > { %v1809_v34 = vadd.f32 %v4470_v55, %v4461_v14  ;;  %v3673_v14 = vld [vmem:[#allocation16 + $0x94] ss:$8 sps:$4 sm:$0xff]  }
 0x37c   : > { %v4472_v56 = vpop.f32.mrf.mxu0  ;;  %2515 = vmatprep.subr.bf16.mxu1 %v3673_v14  ;;  %v3680_v55 = vld [vmem:[#allocation17 + $0x30] sm:$0xff]  }
 0x37d   : > { %v1811_v37 = vadd.f32 %v4472_v56, %v4463_v17  ;;  %2516 = vmatpush2.bf16.msra.mxu1 %v3671_v50  ;;  %v3676_v17 = vld [vmem:[#allocation16 + $0x84] ss:$8 sps:$4 sm:$0xff]  }
 0x37e   : > { %v1812_v57 = vpop.f32.mrf.mxu0  ;;  %2517 = vmatprep.subr.bf16.mxu1 %v3676_v17  ;;  %v3681_v56 = vld [vmem:[#allocation17 + $0x68] sm:$0xff]  }
 0x37f   : > { %v3682_v57 = vld [vmem:[#allocation17 + $0x28] sm:$0xff]  }
 0x380   : > { %v1813_v58 = vpop.f32.mrf.mxu0 }
 0x381   : > { %2518 = vmatpush2.bf16.msra.mxu1 %v3674_v51  ;;  %v3683_v58 = vld [vmem:[#allocation17 + $0x60] sm:$0xff]  }
 0x402   : > { %v2009_v36 = vpop.f32.mrf.mxu1 }
 0x403   : > { %v2010_v38 = vadd.f32 %v2009_v36, %v1809_v34 }
 0x404   : > { %v2011_v40 = vpop.f32.mrf.mxu1 }
 0x405   : > { %v2028_v41 = vadd.f32 %v2021_v35, %v2010_v38  ;;  %v2012_v42 = vadd.f32 %v2011_v40, %v1811_v37 }
 0x406   : > { %v2013_v43 = vpop.f32.mrf.mxu1 }
 0x407   : > { %v2029_v44 = vadd.f32 %v2025_v39, %v2012_v42  ;;  %v2030_v45 = vmax.f32 %v2028_v41, 0.0 }
 0x408   : > { %v2014_v46 = vpop.f32.mrf.mxu1 }
 0x409   : > { %v2031_v47 = vmax.f32 %v2029_v44, 0.0  ;;  %v2032_v49 = vpack.c.bf16 %v2030_v45, %v2030_v45 }
 0x40b   : > { %v2033_v48 = vpack.c.bf16 %v2031_v47, %v2031_v47 }
 0x40d   : > { %2270 = vmatprep.mubr.bf16.mxu0 %v2033_v48 }
 0x40e   : > { %2271 = vmatmul.mubr.bf16.vlgmr.msra.gmra.mxu0 %v2032_v49 }
 0x40f   : > { %3173 = vmatpush3.bf16.msra.mxu0 %v3678_v53 }
 0x410   : > { %3174 = vmatprep.subr.bf16.mxu0 %v3679_v54 }
 0x413   : > { %3175 = vmatpush3.bf16.msra.mxu0 %v3680_v55 }
 0x414   : > { %3176 = vmatprep.subr.bf16.mxu0 %v3681_v56 }
 0x417   : > { %3177 = vmatpush3.bf16.msra.mxu0 %v3682_v57 }
 0x418   : > { %3178 = vmatprep.subr.bf16.mxu0 %v3683_v58 }
 0x41b   : > { %3179 = vmatpush3.bf16.msra.mxu0 %v3684_v59 }
 0x41c   : > { %3180 = vmatprep.subr.bf16.mxu0 %v3685_v60 }
 0x41f   : > { %3181 = vmatpush3.bf16.msra.mxu0 %v3686_v61 }
 0x420   : > { %3182 = vmatprep.subr.bf16.mxu0 %v3687_v62 }
 0x423   : > { %3183 = vmatpush3.bf16.msra.mxu0 %v3688_v63 }
 0x424   : > { %3184 = vmatprep.subr.bf16.mxu0 %v3689_v16 }
 0x427   : > { %3185 = vmatpush3.bf16.msra.mxu0 %v3690_v18 }
 0x428   : > { %3186 = vmatprep.subr.bf16.mxu0 %v3691_v19 }
 0x42b   : > { %3187 = vmatpush3.bf16.msra.mxu0 %v3692_v20 }
 0x4ce   : > { %v2272_v3 = vpop.f32.mrf.mxu0 }
 0x4cf   : > { %v2273_v5 = vadd.f32 %v2272_v3, %v2071_v1 }
 0x4d0   : > { %v2274_v7 = vpop.f32.mrf.mxu0 }
 0x4d1   : > { %v2275_v8 = vadd.f32 %v2274_v7, %v2075_v2  ;;  %v2279_v9 = vmax.f32 %v2273_v5, 0.0 }
 0x4d2   : > { %v2276_v10 = vpop.f32.mrf.mxu0 }
 0x4d3   : > { %v2280_v11 = vmax.f32 %v2275_v8, 0.0  ;;  %v2281_v15 = vpack.c.bf16 %v2279_v9, %v2279_v9 }
 0x4d4   : > { %v2277_v12 = vpop.f32.mrf.mxu0 }
 0x4d5   : > { %v2282_v13 = vpack.c.bf16 %v2280_v11, %v2280_v11 }
 0x4d7   : > { %2519 = vmatprep.mubr.bf16.mxu1 %v2282_v13 }
 0x4d8   : > { %2520 = vmatmul.mubr.bf16.vlgmr.msra.gmra.mxu1 %v2281_v15 }
 0x598   : > { %v2521_v24 = vpop.f32.mrf.mxu1 }
 0x599   : > { %v2522_v25 = vadd.f32 %v2521_v24, %v2320_v22 }
 0x59a   : > { %v2523_v26 = vpop.f32.mrf.mxu1 }
 0x59b   : > { %v2524_v27 = vadd.f32 %v2523_v26, %v2324_v23  ;;  %v2528_v30 = vpack.c.bf16 %v2522_v25, %v2522_v25 }
 0x59c   : > { %v2525_v28 = vpop.f32.mrf.mxu1 }
 0x59d   : > { %v2529_v29 = vpack.c.bf16 %v2524_v27, %v2524_v27 }
 0x59e   : > { %v2526_v31 = vpop.f32.mrf.mxu1 }
 0x59f   : > { %2697 = vmatprep.mubr.bf16.mxu0 %v2529_v29 }
 0x5a0   : > { %2698 = vmatmul.mubr.bf16.vlgmr.msra.gmra.mxu0 %v2528_v30 }
 0x660   : > { %v3188_v32 = vpop.f32.mrf.mxu0 }
 0x662   : > { %v3189_v33 = vpop.f32.mrf.mxu0 }
 0x663   : > { %v3190_v6 = vadd.f32 %v3189_v33, %v3188_v32 }
 0x664   : > { %v3191_v34 = vpop.f32.mrf.mxu0 }
 0x665   : > { %v2700_v35 = vadd.f32 %v3190_v6, %v3150_v4 }
 0x666   : > { %v3192_v36 = vpop.f32.mrf.mxu0 }
 0x667   : > { %2705 = vst [vmem:[%s717_s13] sm:$0xff] %v2700_v35 }
 0x668   : > { %3970 = shalt.err (!%p3967_p10)
}
 0x669   : > { %s3971_s15 = scalar_lea.hbm %s4501_s4, 128  ;;  %s3975_s30 = scalar_lea.hbm %s4612_s1, 256 }
 0x66a   : > { %p3972_p13 = scmp.ne.s32.totalorder %s4501_s4, %s3971_s15  ;;  %p3976_p9 = scmp.lt.s32.totalorder %s4501_s4, %s4612_s1 }
 0x66b   : > { %p3977_p12 = scmp.lt.s32.totalorder %s3975_s30, %s3971_s15 }
 0x66c   : > { %p3973_p2 = pnand %p3972_p13, %p4613_p4 }
 0x66d   : > { %p3978_p0 = por %p3977_p12, %p3976_p9 }
 0x66e   : > { %p3974_p5 = pneg %p3973_p2 }
 0x670   : > { %p3979_p1 = pnand %p3978_p0, %p3974_p5 }
 0x672   : > { %3982 = shalt.err (!%p3979_p1)
}
 0x673   : > { %3230 = dma.vmem_to_hbm [thread:$0]  (%p4613_p4), %s2721_s16, 128, %s4501_s4, %s2707_s28  }
 0x674 PF: > { %s2732_s23 = sand.u32 1, %s4033_s24   ;;  %p4614_p6 = scmp.ne.s32.totalorder %s4593_s2, 0 }
 0x675   : > { %p4615_p11 = scmp.ge.s32.totalorder %s4045_s27, 2  ;;  %s2733_s13 = scalar_lea.sflag [#allocation4], %s2732_s23 }
 0x677   : > { %p3265_p3 = pnand %p4615_p11, %p4614_p6 }
 0x679   : > { %p3266_p7 = pneg %p3265_p3 }
 0x67b   : > { %4028 = dma.done.wait (%p3266_p7), %s2733_s13, 128  }
 0x67c   : > { %4030 = vsyncadd (%p3266_p7), %s2733_s13, 4294967168  ;;  %s4616_s18 = sld [smem:[#allocation28_spill]]  ;;  %p37_p8 = scmp.ge.s32.totalorder %s4291_s20, 4  }
 0x67d   : > { %s4617_s26 = sld [smem:[#allocation29_spill]]  ;;  %s4618_s24 = smov %s4037_s25 }
 0x67e   : > { %s4620_s27 = smov %s4291_s20  ;;  %39 = sbr.rel (!%p37_p8) target bundleno = 24 (0x18), region = 178 }
 0x682   : > { %s4619_s25 = smov %s4616_s18 }
 0x683   :  { %2738 = vsyncpa [#allocation3], 1 }
 0x684   :  { %2740 = vsyncpa [#allocation3 + $0x1], 1 }
 0x685   :  { %2741 = vsyncpa [#allocation6], 1 }
 0x686   :  { %2743 = vsyncpa [#allocation6 + $0x1], 1 }
 0x687   :  { %2744 = vsyncpa [#allocation9], 1 }
 0x688   :  { %2745 = vsyncpa [#allocation12], 1 }
 0x689   :  { %2746 = vsyncpa [#allocation15], 1 }
 0x68a   :  { %2747 = vsyncpa [#allocation18], 1 }
 0x68b   :  { %2748 = vsyncpa [#allocation4], 1 }
 0x68c   :  { %2750 = vsyncpa [#allocation4 + $0x1], 1 }

</bundles_post_ra>
